<compile_context>
chip_gen: v5e
topology: v5e:2x2
jax: 0.10.0
libtpu: 0.0.40
codegen_flags: <defaults>
</compile_context>

<pallas_src>
import functools

import numpy as np
import jax
import jax.numpy as jnp
from jax.experimental import pallas as pl
from jax.experimental.pallas import tpu as pltpu

# ------------------------------ static geometry ------------------------------

IMG = 16                  # input images are IMG x IMG, single channel
NLANE = IMG * IMG         # flat-lane width of one input image (256)
C1, C2 = 6, 16            # conv channel counts (fixed by the torch module)
KH = KW = 3
POOL1 = 7                 # pool1 spatial extent (14x14 conv1 -> 7x7)
FLAT = C2 * 2 * 2         # flattened CNN feature size for 16x16 inputs (= 64)

GSTRIDE1 = 64             # per-channel column stride in the pool1 layout
P1 = C1 * GSTRIDE1        # pool1 slab width  = 384  (multiple of 128)
P2 = 128                  # pool2 slab width  = 128  (>= FLAT, lane aligned)

TB_MAX = 128              # batch tile (fills the MXU M dimension)

_SELU_ALPHA = 1.6732632423543772
_SELU_SCALE = 1.0507009873554805


def _relu6(x):
    return jnp.clip(x, 0.0, 6.0)


def _selu(x):
    return _SELU_SCALE * jnp.where(x > 0, x, _SELU_ALPHA * (jnp.exp(x) - 1.0))


def _round_up(n, m):
    return ((n + m - 1) // m) * m


# --------------------------------- kernel -------------------------------------
#
# Column layouts (chosen on the host when scattering the weights):
#   conv1 matmul output (width 4*P1): value for (channel co, output pixel
#     (2p+a, 2q+b)) sits at column (2a+b)*P1 + co*64 + 7p + q, so MaxPool2d(2,2)
#     is the max of the four contiguous P1-wide slabs; the pooled value for
#     (co,p,q) lands at column co*64 + 7p + q of a (TB,P1) array.
#   conv2 matmul output (width 4*P2): value for (co, (2p'+a, 2q'+b)) sits at
#     column (2a+b)*P2 + co*4 + 2p' + q'; after the slab max the flattened
#     feature index co*4 + 2p' + q' (== torch Flatten order) is the column.
# Unused columns carry zero weight and zero bias -> they stay exactly 0.

def _dsm_kernel(x_ref, w1_ref, b1_ref, w2_ref, b2_ref, w3_ref, b3_ref,
                w4_ref, b4_ref, add_ref, out_ref, *, k, inv_temp):
    f32 = jnp.float32
    x = x_ref[...]                                                   # (TB, 256)

    # Conv2d(1,6,3) + bias + ReLU6 as one scattered MXU matmul.
    z1 = _relu6(jnp.dot(x, w1_ref[...], preferred_element_type=f32)
                + b1_ref[...])                                       # (TB, 4*P1)
    # MaxPool2d(2,2): max of the four 128-aligned candidate slabs.
    pool1 = jnp.maximum(jnp.maximum(z1[:, 0:P1], z1[:, P1:2 * P1]),
                        jnp.maximum(z1[:, 2 * P1:3 * P1], z1[:, 3 * P1:4 * P1]))

    # Conv2d(6,16,3) + bias + ReLU6 as one scattered MXU matmul.
    z2 = _relu6(jnp.dot(pool1, w2_ref[...], preferred_element_type=f32)
                + b2_ref[...])                                       # (TB, 4*P2)
    # MaxPool2d(2,2) + Flatten (torch order by construction) + ReLU6.
    feat = jnp.maximum(jnp.maximum(z2[:, 0:P2], z2[:, P2:2 * P2]),
                       jnp.maximum(z2[:, 2 * P2:3 * P2], z2[:, 3 * P2:4 * P2]))
    feat = _relu6(feat)                                              # (TB, P2)

    # Linear(64, hidden) + ReLU6 (hidden padded to a multiple of 128).
    xrep = _relu6(jnp.dot(feat, w3_ref[...], preferred_element_type=f32)
                  + b3_ref[...])                                     # (TB, Hpad)

    # Fused DSM heads: [shapeg | scaleg | gate | zero pad].
    h = jnp.dot(xrep, w4_ref[...], preferred_element_type=f32) + b4_ref[...]
    lane = jax.lax.broadcasted_iota(jnp.int32, h.shape, 1)
    out_ref[...] = jnp.where(lane < 2 * k,
                             _selu(h) + add_ref[...],   # SELU(.) + shape/scale
                             h * inv_temp)              # gate logits / temp


# ------------------------------ JAX wrappers -----------------------------------

@functools.partial(jax.jit, static_argnames=("k", "temp"))
def forward(kp, x, *, k, temp=1000.0):
    """Forward pass of DeepConvolutionalSurvivalMachinesTorch (Weibull, risk='1')."""
    b = x.shape[0]
    xf = x.reshape(b, -1).astype(jnp.float32)
    assert xf.shape[1] == NLANE, "kernel is specialized to 16x16 single-channel inputs"

    hidden_pad = kp["w3"].shape[1]
    head_pad = kp["w4"].shape[1]

    tb = min(TB_MAX, _round_up(b, 8))       # sublane-aligned batch tile
    bpad = _round_up(b, tb)
    xf = jnp.pad(xf, ((0, bpad - b), (0, 0)))
    grid = (bpad // tb,)

    kernel = functools.partial(_dsm_kernel, k=k, inv_temp=1.0 / float(temp))

    flops = 2 * bpad * (NLANE * 4 * P1 + P1 * 4 * P2
                        + P2 * hidden_pad + hidden_pad * head_pad)
    weight_bytes = 4 * sum(int(kp[n].size) for n in
                           ("w1", "b1", "w2", "b2", "w3", "b3", "w4", "b4", "add"))
    bytes_accessed = 4 * bpad * (NLANE + head_pad) + weight_bytes

    out = pl.pallas_call(
        kernel,
        out_shape=jax.ShapeDtypeStruct((bpad, head_pad), jnp.float32),
        grid=grid,
        in_specs=[
            pl.BlockSpec((tb, NLANE), lambda i: (i, 0)),             # image tile
            # Constant (weight) operands: whole-array blocks, index (0,0) so
            # they are fetched once and stay resident across grid steps.
            pl.BlockSpec(kp["w1"].shape, lambda i: (0, 0)),          # conv1 slab
            pl.BlockSpec(kp["b1"].shape, lambda i: (0, 0)),
            pl.BlockSpec(kp["w2"].shape, lambda i: (0, 0)),          # conv2 slab
            pl.BlockSpec(kp["b2"].shape, lambda i: (0, 0)),
            pl.BlockSpec(kp["w3"].shape, lambda i: (0, 0)),          # linear
            pl.BlockSpec(kp["b3"].shape, lambda i: (0, 0)),
            pl.BlockSpec(kp["w4"].shape, lambda i: (0, 0)),          # fused heads
            pl.BlockSpec(kp["b4"].shape, lambda i: (0, 0)),
            pl.BlockSpec(kp["add"].shape, lambda i: (0, 0)),         # shape/scale
        ],
        out_specs=pl.BlockSpec((tb, head_pad), lambda i: (i, 0)),
        compiler_params=pltpu.CompilerParams(
            dimension_semantics=("parallel",),
            vmem_limit_bytes=32 * 1024 * 1024),
        cost_estimate=pl.CostEstimate(flops=int(flops),
                                      transcendentals=int(bpad * head_pad),
                                      bytes_accessed=int(bytes_accessed)),
    )(xf, kp["w1"], kp["b1"], kp["w2"], kp["b2"],
      kp["w3"], kp["b3"], kp["w4"], kp["b4"], kp["add"])

    out = out[:b]
    return out[:, :k], out[:, k:2 * k], out[:, 2 * k:3 * k]


def init_torch_params(key, k, hidden):
    """Deterministic synthetic parameters in the torch module's native shapes."""
    keys = jax.random.split(key, 11)
    nrm = lambda kk, shape, s=0.1: s * jax.random.normal(kk, shape, jnp.float32)
    return dict(
        conv1_w=nrm(keys[0], (C1, 1, KH, KW)),        # nn.Conv2d(1, 6, 3)
        conv1_b=nrm(keys[1], (C1,)),
        conv2_w=nrm(keys[2], (C2, C1, KH, KW)),       # nn.Conv2d(6, 16, 3)
        conv2_b=nrm(keys[3], (C2,)),
        lin_w=nrm(keys[4], (hidden, FLAT)),           # nn.Linear(64, hidden)
        lin_b=nrm(keys[5], (hidden,)),
        shapeg_w=nrm(keys[6], (k, hidden)),           # nn.Linear(hidden, k)
        shapeg_b=nrm(keys[7], (k,)),
        scaleg_w=nrm(keys[8], (k, hidden)),
        scaleg_b=nrm(keys[9], (k,)),
        gate_w=nrm(keys[10], (k, hidden)),            # nn.Linear(hidden, k, bias=False)
        shape_param=-jnp.ones((k,), jnp.float32),     # Weibull init: -ones(k)
        scale_param=-jnp.ones((k,), jnp.float32),
    )


def prepare_params(p):
    """Scatter the torch-shaped parameters into the kernel's matmul slab layouts."""
    k = int(p["shapeg_b"].shape[0])
    hidden = int(p["lin_b"].shape[0])
    hidden_pad = _round_up(hidden, 128)
    head_pad = _round_up(max(3 * k, 1), 128)

    c1w = np.asarray(p["conv1_w"], np.float32)
    c1b = np.asarray(p["conv1_b"], np.float32)
    c2w = np.asarray(p["conv2_w"], np.float32)
    c2b = np.asarray(p["conv2_b"], np.float32)

    # --- conv1 slab: (256, 4*P1).  Column for (co, pixel (2p+a, 2q+b)) is
    #     (2a+b)*P1 + co*64 + 7p + q; its 9 taps scatter on input lanes
    #     16*(2p+a+ki) + (2q+b+kj).  Unused columns keep zero weight & bias.
    w1 = np.zeros((NLANE, 4 * P1), np.float32)
    b1 = np.zeros((1, 4 * P1), np.float32)
    for co in range(C1):
        for pp in range(POOL1):
            for qq in range(POOL1):
                g = co * GSTRIDE1 + POOL1 * pp + qq
                for a in range(2):
                    for bb in range(2):
                        col = (2 * a + bb) * P1 + g
                        b1[0, col] = c1b[co]
                        oi, oj = 2 * pp + a, 2 * qq + bb
                        for ki in range(KH):
                            for kj in range(KW):
                                w1[(oi + ki) * IMG + (oj + kj), col] = c1w[co, 0, ki, kj]

    # --- conv2 slab: (P1, 4*P2).  Input row for pool1 value (ci, r, s) is
    #     ci*64 + 7r + s; column for (co, pixel (2p'+a, 2q'+b)) is
    #     (2a+b)*P2 + co*4 + 2p' + q' (== torch Flatten order after pooling).
    w2 = np.zeros((P1, 4 * P2), np.float32)
    b2 = np.zeros((1, 4 * P2), np.float32)
    for co in range(C2):
        for pp in range(2):
            for qq in range(2):
                g = co * 4 + 2 * pp + qq
                for a in range(2):
                    for bb in range(2):
                        col = (2 * a + bb) * P2 + g
                        b2[0, col] = c2b[co]
                        oi, oj = 2 * pp + a, 2 * qq + bb
                        for ci in range(C1):
                            for ki in range(KH):
                                for kj in range(KW):
                                    row = ci * GSTRIDE1 + POOL1 * (oi + ki) + (oj + kj)
                                    w2[row, col] = c2w[co, ci, ki, kj]

    # --- Linear(64, hidden), hidden padded to a multiple of 128 (lane dense).
    w3 = np.zeros((P2, hidden_pad), np.float32)
    w3[:FLAT, :hidden] = np.asarray(p["lin_w"], np.float32).T
    b3 = np.zeros((1, hidden_pad), np.float32)
    b3[0, :hidden] = np.asarray(p["lin_b"], np.float32)

    # --- fused [shapeg | scaleg | gate] head, zero padded to head_pad lanes.
    w4 = np.zeros((hidden_pad, head_pad), np.float32)
    w4[:hidden, 0:k] = np.asarray(p["shapeg_w"], np.float32).T
    w4[:hidden, k:2 * k] = np.asarray(p["scaleg_w"], np.float32).T
    w4[:hidden, 2 * k:3 * k] = np.asarray(p["gate_w"], np.float32).T
    b4 = np.zeros((1, head_pad), np.float32)
    b4[0, 0:k] = np.asarray(p["shapeg_b"], np.float32)
    b4[0, k:2 * k] = np.asarray(p["scaleg_b"], np.float32)
    add = np.zeros((1, head_pad), np.float32)
    add[0, 0:k] = np.asarray(p["shape_param"], np.float32)
    add[0, k:2 * k] = np.asarray(p["scale_param"], np.float32)

    return dict(w1=jnp.asarray(w1), b1=jnp.asarray(b1),
                w2=jnp.asarray(w2), b2=jnp.asarray(b2),
                w3=jnp.asarray(w3), b3=jnp.asarray(b3),
                w4=jnp.asarray(w4), b4=jnp.asarray(b4),
                add=jnp.asarray(add))


def reference_forward(p, x, temp=1000.0):
    """Pure-JAX (XLA) replica of the torch module, used only for verification."""
    b = x.shape[0]

    def conv(inp, w, bias):
        out = jax.lax.conv_general_dilated(
            inp, w, window_strides=(1, 1), padding="VALID",
            dimension_numbers=("NCHW", "OIHW", "NCHW"))
        return out + bias[None, :, None, None]

    def pool(inp):                                    # nn.MaxPool2d(2, 2), floor mode
        n, c, h, w = inp.shape
        v = inp[:, :, : (h // 2) * 2, : (w // 2) * 2]
        return v.reshape(n, c, h // 2, 2, w // 2, 2).max(axis=(3, 5))

    y = pool(_relu6(conv(x, p["conv1_w"], p["conv1_b"])))
    y = pool(_relu6(conv(y, p["conv2_w"], p["conv2_b"])))
    xrep = _relu6(_relu6(y.reshape(b, -1)) @ p["lin_w"].T + p["lin_b"])
    shape_out = jax.nn.selu(xrep @ p["shapeg_w"].T + p["shapeg_b"]) + p["shape_param"]
    scale_out = jax.nn.selu(xrep @ p["scaleg_w"].T + p["scaleg_b"]) + p["scale_param"]
    gate_out = (xrep @ p["gate_w"].T) / temp
    return shape_out, scale_out, gate_out


if __name__ == "__main__":
    key = jax.random.PRNGKey(0)
    kx, kparam_key = jax.random.split(key)

    B, hidden, k = 2, 32, 4
    x = jax.random.normal(kx, (B, 1, IMG, IMG), jnp.float32)

    torch_params = init_torch_params(kparam_key, k, hidden)
    kernel_params = prepare_params(torch_params)

    shape_out, scale_out, gate_out = forward(kernel_params, x, k=k, temp=1000.0)
    jax.block_until_ready((shape_out, scale_out, gate_out))

    assert shape_out.shape == (B, k)
    assert scale_out.shape == (B, k)
    assert gate_out.shape == (B, k)

    # Numerical check against a pure-JAX replica of the torch forward.
    # (All kernel matmuls run in f32, so these tolerances are very loose.)
    ref_shape, ref_scale, ref_gate = reference_forward(torch_params, x, temp=1000.0)
    assert float(jnp.max(jnp.abs(shape_out - ref_shape))) < 5e-2
    assert float(jnp.max(jnp.abs(scale_out - ref_scale))) < 5e-2
    assert float(jnp.max(jnp.abs(gate_out - ref_gate))) < 1e-3

    print("KERNEL_OK")
</pallas_src>

<mosaic_0001>
module attributes {stable_mosaic.version = 11 : i64} {
  func.func @_dsm_kernel(%arg0: i32, %arg1: memref<8x256xf32, #tpu.memory_space<vmem>>, %arg2: memref<256x1536xf32, #tpu.memory_space<vmem>>, %arg3: memref<1x1536xf32, #tpu.memory_space<vmem>>, %arg4: memref<384x512xf32, #tpu.memory_space<vmem>>, %arg5: memref<1x512xf32, #tpu.memory_space<vmem>>, %arg6: memref<128x128xf32, #tpu.memory_space<vmem>>, %arg7: memref<1x128xf32, #tpu.memory_space<vmem>>, %arg8: memref<128x128xf32, #tpu.memory_space<vmem>>, %arg9: memref<1x128xf32, #tpu.memory_space<vmem>>, %arg10: memref<1x128xf32, #tpu.memory_space<vmem>>, %arg11: memref<8x128xf32, #tpu.memory_space<vmem>>) attributes {dimension_semantics = [#tpu.dimension_semantics<parallel>], iteration_bounds = array<i64: 1>, scalar_prefetch = 0 : i64, scratch_operands = 0 : i64, tpu.core_type = #tpu.core_type<tc>, window_params = [{transform_indices = @transform_0, window_bounds = array<i64: 8, 256>}, {pipeline_mode = #tpu.pipeline_mode<synchronous>, transform_indices = @transform_1, window_bounds = array<i64: 256, 1536>}, {pipeline_mode = #tpu.pipeline_mode<synchronous>, transform_indices = @transform_2, window_bounds = array<i64: 1, 1536>}, {pipeline_mode = #tpu.pipeline_mode<synchronous>, transform_indices = @transform_3, window_bounds = array<i64: 384, 512>}, {pipeline_mode = #tpu.pipeline_mode<synchronous>, transform_indices = @transform_4, window_bounds = array<i64: 1, 512>}, {pipeline_mode = #tpu.pipeline_mode<synchronous>, transform_indices = @transform_5, window_bounds = array<i64: 128, 128>}, {pipeline_mode = #tpu.pipeline_mode<synchronous>, transform_indices = @transform_6, window_bounds = array<i64: 1, 128>}, {pipeline_mode = #tpu.pipeline_mode<synchronous>, transform_indices = @transform_7, window_bounds = array<i64: 128, 128>}, {pipeline_mode = #tpu.pipeline_mode<synchronous>, transform_indices = @transform_8, window_bounds = array<i64: 1, 128>}, {pipeline_mode = #tpu.pipeline_mode<synchronous>, transform_indices = @transform_9, window_bounds = array<i64: 1, 128>}, {transform_indices = @transform_10, window_bounds = array<i64: 8, 128>}]} {
    %c0 = arith.constant 0 : index
    %c0_0 = arith.constant 0 : index
    %0 = vector.load %arg1[%c0, %c0_0] : memref<8x256xf32, #tpu.memory_space<vmem>>, vector<8x256xf32>
    %c0_1 = arith.constant 0 : index
    %c0_2 = arith.constant 0 : index
    %1 = vector.load %arg2[%c0_1, %c0_2] : memref<256x1536xf32, #tpu.memory_space<vmem>>, vector<256x1536xf32>
    %cst = arith.constant dense<0.000000e+00> : vector<8x1536xf32>
    %2 = tpu.matmul %0, %1, %cst {dimension_numbers = #tpu.dot_dimension_numbers<[1], [0], [0], [1], [0, 0, 1, 1], [], []>} : vector<8x256xf32>, vector<256x1536xf32>, vector<8x1536xf32> -> vector<8x1536xf32>
    %c0_3 = arith.constant 0 : index
    %c0_4 = arith.constant 0 : index
    %3 = vector.load %arg3[%c0_3, %c0_4] : memref<1x1536xf32, #tpu.memory_space<vmem>>, vector<1x1536xf32>
    %4 = vector.broadcast %3 : vector<1x1536xf32> to vector<8x1536xf32>
    %5 = arith.addf %2, %4 : vector<8x1536xf32>
    %cst_5 = arith.constant 0.000000e+00 : f32
    %cst_6 = arith.constant 6.000000e+00 : f32
    %6 = vector.broadcast %cst_5 : f32 to vector<8x1536xf32>
    %7 = arith.maximumf %6, %5 : vector<8x1536xf32>
    %8 = vector.broadcast %cst_6 : f32 to vector<8x1536xf32>
    %9 = arith.minimumf %8, %7 : vector<8x1536xf32>
    %10 = vector.extract_strided_slice %9 {offsets = [0, 0], sizes = [8, 384], strides = [1, 1]} : vector<8x1536xf32> to vector<8x384xf32>
    %11 = vector.extract_strided_slice %9 {offsets = [0, 384], sizes = [8, 384], strides = [1, 1]} : vector<8x1536xf32> to vector<8x384xf32>
    %12 = arith.maximumf %10, %11 : vector<8x384xf32>
    %13 = vector.extract_strided_slice %9 {offsets = [0, 768], sizes = [8, 384], strides = [1, 1]} : vector<8x1536xf32> to vector<8x384xf32>
    %14 = vector.extract_strided_slice %9 {offsets = [0, 1152], sizes = [8, 384], strides = [1, 1]} : vector<8x1536xf32> to vector<8x384xf32>
    %15 = arith.maximumf %13, %14 : vector<8x384xf32>
    %16 = arith.maximumf %12, %15 : vector<8x384xf32>
    %c0_7 = arith.constant 0 : index
    %c0_8 = arith.constant 0 : index
    %17 = vector.load %arg4[%c0_7, %c0_8] : memref<384x512xf32, #tpu.memory_space<vmem>>, vector<384x512xf32>
    %cst_9 = arith.constant dense<0.000000e+00> : vector<8x512xf32>
    %18 = tpu.matmul %16, %17, %cst_9 {dimension_numbers = #tpu.dot_dimension_numbers<[1], [0], [0], [1], [0, 0, 1, 1], [], []>} : vector<8x384xf32>, vector<384x512xf32>, vector<8x512xf32> -> vector<8x512xf32>
    %c0_10 = arith.constant 0 : index
    %c0_11 = arith.constant 0 : index
    %19 = vector.load %arg5[%c0_10, %c0_11] : memref<1x512xf32, #tpu.memory_space<vmem>>, vector<1x512xf32>
    %20 = vector.broadcast %19 : vector<1x512xf32> to vector<8x512xf32>
    %21 = arith.addf %18, %20 : vector<8x512xf32>
    %cst_12 = arith.constant 0.000000e+00 : f32
    %cst_13 = arith.constant 6.000000e+00 : f32
    %22 = vector.broadcast %cst_12 : f32 to vector<8x512xf32>
    %23 = arith.maximumf %22, %21 : vector<8x512xf32>
    %24 = vector.broadcast %cst_13 : f32 to vector<8x512xf32>
    %25 = arith.minimumf %24, %23 : vector<8x512xf32>
    %26 = vector.extract_strided_slice %25 {offsets = [0, 0], sizes = [8, 128], strides = [1, 1]} : vector<8x512xf32> to vector<8x128xf32>
    %27 = vector.extract_strided_slice %25 {offsets = [0, 128], sizes = [8, 128], strides = [1, 1]} : vector<8x512xf32> to vector<8x128xf32>
    %28 = arith.maximumf %26, %27 : vector<8x128xf32>
    %29 = vector.extract_strided_slice %25 {offsets = [0, 256], sizes = [8, 128], strides = [1, 1]} : vector<8x512xf32> to vector<8x128xf32>
    %30 = vector.extract_strided_slice %25 {offsets = [0, 384], sizes = [8, 128], strides = [1, 1]} : vector<8x512xf32> to vector<8x128xf32>
    %31 = arith.maximumf %29, %30 : vector<8x128xf32>
    %32 = arith.maximumf %28, %31 : vector<8x128xf32>
    %cst_14 = arith.constant 0.000000e+00 : f32
    %cst_15 = arith.constant 6.000000e+00 : f32
    %33 = vector.broadcast %cst_14 : f32 to vector<8x128xf32>
    %34 = arith.maximumf %33, %32 : vector<8x128xf32>
    %35 = vector.broadcast %cst_15 : f32 to vector<8x128xf32>
    %36 = arith.minimumf %35, %34 : vector<8x128xf32>
    %c0_16 = arith.constant 0 : index
    %c0_17 = arith.constant 0 : index
    %37 = vector.load %arg6[%c0_16, %c0_17] : memref<128x128xf32, #tpu.memory_space<vmem>>, vector<128x128xf32>
    %cst_18 = arith.constant dense<0.000000e+00> : vector<8x128xf32>
    %38 = tpu.matmul %36, %37, %cst_18 {dimension_numbers = #tpu.dot_dimension_numbers<[1], [0], [0], [1], [0, 0, 1, 1], [], []>} : vector<8x128xf32>, vector<128x128xf32>, vector<8x128xf32> -> vector<8x128xf32>
    %c0_19 = arith.constant 0 : index
    %c0_20 = arith.constant 0 : index
    %39 = vector.load %arg7[%c0_19, %c0_20] : memref<1x128xf32, #tpu.memory_space<vmem>>, vector<1x128xf32>
    %40 = vector.broadcast %39 : vector<1x128xf32> to vector<8x128xf32>
    %41 = arith.addf %38, %40 : vector<8x128xf32>
    %cst_21 = arith.constant 0.000000e+00 : f32
    %cst_22 = arith.constant 6.000000e+00 : f32
    %42 = vector.broadcast %cst_21 : f32 to vector<8x128xf32>
    %43 = arith.maximumf %42, %41 : vector<8x128xf32>
    %44 = vector.broadcast %cst_22 : f32 to vector<8x128xf32>
    %45 = arith.minimumf %44, %43 : vector<8x128xf32>
    %c0_23 = arith.constant 0 : index
    %c0_24 = arith.constant 0 : index
    %46 = vector.load %arg8[%c0_23, %c0_24] : memref<128x128xf32, #tpu.memory_space<vmem>>, vector<128x128xf32>
    %cst_25 = arith.constant dense<0.000000e+00> : vector<8x128xf32>
    %47 = tpu.matmul %45, %46, %cst_25 {dimension_numbers = #tpu.dot_dimension_numbers<[1], [0], [0], [1], [0, 0, 1, 1], [], []>} : vector<8x128xf32>, vector<128x128xf32>, vector<8x128xf32> -> vector<8x128xf32>
    %c0_26 = arith.constant 0 : index
    %c0_27 = arith.constant 0 : index
    %48 = vector.load %arg9[%c0_26, %c0_27] : memref<1x128xf32, #tpu.memory_space<vmem>>, vector<1x128xf32>
    %49 = vector.broadcast %48 : vector<1x128xf32> to vector<8x128xf32>
    %50 = arith.addf %47, %49 : vector<8x128xf32>
    %51 = tpu.iota {dimensions = array<i32: 1>} : vector<8x128xi32>
    %c8_i32 = arith.constant 8 : i32
    %52 = vector.broadcast %c8_i32 : i32 to vector<8x128xi32>
    %53 = arith.cmpi slt, %51, %52 : vector<8x128xi32>
    %cst_28 = arith.constant 0.000000e+00 : f32
    %54 = vector.broadcast %cst_28 : f32 to vector<8x128xf32>
    %55 = arith.cmpf ogt, %50, %54 : vector<8x128xf32>
    %56 = math.exp %50 : vector<8x128xf32>
    %cst_29 = arith.constant 1.000000e+00 : f32
    %57 = vector.broadcast %cst_29 : f32 to vector<8x128xf32>
    %58 = arith.subf %56, %57 : vector<8x128xf32>
    %cst_30 = arith.constant 1.67326319 : f32
    %59 = vector.broadcast %cst_30 : f32 to vector<8x128xf32>
    %60 = arith.mulf %59, %58 : vector<8x128xf32>
    %61 = arith.select %55, %50, %60 : vector<8x128xi1>, vector<8x128xf32>
    %cst_31 = arith.constant 1.05070102 : f32
    %62 = vector.broadcast %cst_31 : f32 to vector<8x128xf32>
    %63 = arith.mulf %62, %61 : vector<8x128xf32>
    %c0_32 = arith.constant 0 : index
    %c0_33 = arith.constant 0 : index
    %64 = vector.load %arg10[%c0_32, %c0_33] : memref<1x128xf32, #tpu.memory_space<vmem>>, vector<1x128xf32>
    %65 = vector.broadcast %64 : vector<1x128xf32> to vector<8x128xf32>
    %66 = arith.addf %63, %65 : vector<8x128xf32>
    %cst_34 = arith.constant 1.000000e-03 : f32
    %67 = vector.broadcast %cst_34 : f32 to vector<8x128xf32>
    %68 = arith.mulf %50, %67 : vector<8x128xf32>
    %69 = arith.select %53, %66, %68 : vector<8x128xi1>, vector<8x128xf32>
    %c0_35 = arith.constant 0 : index
    %c0_36 = arith.constant 0 : index
    %70 = vector.load %arg11[%c0_35, %c0_36] : memref<8x128xf32, #tpu.memory_space<vmem>>, vector<8x128xf32>
    tpu.vector_store %arg11[%c0_35, %c0_36], %69 {strides = array<i32>} : memref<8x128xf32, #tpu.memory_space<vmem>>, vector<8x128xf32>,
    return
  }
  func.func @transform_0(%arg0: i32) -> (i32, i32) {
    %c0_i32 = arith.constant 0 : i32
    %c0_i32_0 = arith.constant 0 : i32
    return %arg0, %c0_i32 : i32, i32
  }
  func.func @transform_1(%arg0: i32) -> (i32, i32) {
    %c0_i32 = arith.constant 0 : i32
    %c0_i32_0 = arith.constant 0 : i32
    %c0_i32_1 = arith.constant 0 : i32
    return %c0_i32, %c0_i32_0 : i32, i32
  }
  func.func @transform_2(%arg0: i32) -> (i32, i32) {
    %c0_i32 = arith.constant 0 : i32
    %c0_i32_0 = arith.constant 0 : i32
    %c0_i32_1 = arith.constant 0 : i32
    return %c0_i32, %c0_i32_0 : i32, i32
  }
  func.func @transform_3(%arg0: i32) -> (i32, i32) {
    %c0_i32 = arith.constant 0 : i32
    %c0_i32_0 = arith.constant 0 : i32
    %c0_i32_1 = arith.constant 0 : i32
    return %c0_i32, %c0_i32_0 : i32, i32
  }
  func.func @transform_4(%arg0: i32) -> (i32, i32) {
    %c0_i32 = arith.constant 0 : i32
    %c0_i32_0 = arith.constant 0 : i32
    %c0_i32_1 = arith.constant 0 : i32
    return %c0_i32, %c0_i32_0 : i32, i32
  }
  func.func @transform_5(%arg0: i32) -> (i32, i32) {
    %c0_i32 = arith.constant 0 : i32
    %c0_i32_0 = arith.constant 0 : i32
    %c0_i32_1 = arith.constant 0 : i32
    return %c0_i32, %c0_i32_0 : i32, i32
  }
  func.func @transform_6(%arg0: i32) -> (i32, i32) {
    %c0_i32 = arith.constant 0 : i32
    %c0_i32_0 = arith.constant 0 : i32
    %c0_i32_1 = arith.constant 0 : i32
    return %c0_i32, %c0_i32_0 : i32, i32
  }
  func.func @transform_7(%arg0: i32) -> (i32, i32) {
    %c0_i32 = arith.constant 0 : i32
    %c0_i32_0 = arith.constant 0 : i32
    %c0_i32_1 = arith.constant 0 : i32
    return %c0_i32, %c0_i32_0 : i32, i32
  }
  func.func @transform_8(%arg0: i32) -> (i32, i32) {
    %c0_i32 = arith.constant 0 : i32
    %c0_i32_0 = arith.constant 0 : i32
    %c0_i32_1 = arith.constant 0 : i32
    return %c0_i32, %c0_i32_0 : i32, i32
  }
  func.func @transform_9(%arg0: i32) -> (i32, i32) {
    %c0_i32 = arith.constant 0 : i32
    %c0_i32_0 = arith.constant 0 : i32
    %c0_i32_1 = arith.constant 0 : i32
    return %c0_i32, %c0_i32_0 : i32, i32
  }
  func.func @transform_10(%arg0: i32) -> (i32, i32) {
    %c0_i32 = arith.constant 0 : i32
    %c0_i32_0 = arith.constant 0 : i32
    return %arg0, %c0_i32 : i32, i32
  }
}

</mosaic_0001>

<bundles_post_ra>
// kernel: forward.1
= control target key start
LH: loop header
LB: loop body
LE: loop exit
PB: predicated region body
PF: predicated region fallthrough
CT: control target
= control target key end

     0   :  { %15 = vsyncpa [#allocation3], 0  ;;  %s2109_s0 = inlined_call_operand.vmem [shape: f32[8,256], index: 0, kind: input, shape index: {}]   ;;  %s2110_s1 = inlined_call_operand.hbm [shape: f32[256,1536], index: 1, kind: input, shape index: {}]   ;;  %s2111_s2 = inlined_call_operand.hbm [shape: f32[1,1536], index: 2, kind: input, shape index: {}]   ;;  %s2112_s3 = inlined_call_operand.hbm [shape: f32[384,512], index: 3, kind: input, shape index: {}]   ;;  %s2113_s4 = inlined_call_operand.hbm [shape: f32[1,512], index: 4, kind: input, shape index: {}]   ;;  %s2114_s5 = inlined_call_operand.hbm [shape: f32[128,128], index: 5, kind: input, shape index: {}]   ;;  %s2115_s6 = inlined_call_operand.hbm [shape: f32[1,128], index: 6, kind: input, shape index: {}]   ;;  %s2116_s7 = inlined_call_operand.hbm [shape: f32[128,128], index: 7, kind: input, shape index: {}]   ;;  %s2117_s8 = inlined_call_operand.hbm [shape: f32[1,128], index: 8, kind: input, shape index: {}]   ;;  %s2118_s9 = inlined_call_operand.hbm [shape: f32[1,128], index: 9, kind: input, shape index: {}]   ;;  %s2119_s10 = inlined_call_operand.vmem [shape: f32[8,128], index: 10, kind: output, shape index: {}]  }
   0x1   :  { %16 = vsyncpa [#allocation5], 0 }
   0x2   :  { %17 = vsyncpa [#allocation8], 0 }
   0x3   :  { %18 = vsyncpa [#allocation11], 0  ;;  %s40_s15 = sshll.u32 %s2111_s2, 4  ;;  %s41_s15 = int_to_ptr.hbm [resolvable:$true] %s40_s15 }
   0x4   :  { %19 = vsyncpa [#allocation14], 0  ;;  %s1905_s16 = smov [#allocation4]   ;;  %s64_s20 = sshll.u32 %s2113_s4, 4  ;;  %s65_s20 = int_to_ptr.hbm [resolvable:$true] %s64_s20 }
   0x5   :  { %s42_s17 = sshll.u32 %s1905_s16, 4  ;;  %s1906_s21 = smov [#allocation7]   ;;  %s43_s17 = int_to_ptr.vmem [resolvable:$true] %s42_s17 }
   0x6   :  { %45 = dma.hbm_to_vmem [thread:$0]  %s41_s15, 192, %s43_s17, [#allocation5]  }
   0x7   :  { %s66_s22 = sshll.u32 %s1906_s21, 4  ;;  %s88_s25 = sshll.u32 %s2115_s6, 4  ;;  %s67_s22 = int_to_ptr.vmem [resolvable:$true] %s66_s22  ;;  %s89_s25 = int_to_ptr.hbm [resolvable:$true] %s88_s25 }
   0x8   :  { %69 = dma.hbm_to_vmem [thread:$0]  %s65_s20, 64, %s67_s22, [#allocation8]  }
   0x9   :  { %s112_s27 = sshll.u32 %s2117_s8, 4  ;;  %s1907_s28 = smov [#allocation10]   ;;  %s113_s27 = int_to_ptr.hbm [resolvable:$true] %s112_s27 }
   0xa   :  { %s90_s29 = sshll.u32 %s1907_s28, 4  ;;  %s1908_s4 = smov [#allocation13]   ;;  %s91_s29 = int_to_ptr.vmem [resolvable:$true] %s90_s29 }
   0xb   :  { %93 = dma.hbm_to_vmem [thread:$0]  %s89_s25, 16, %s91_s29, [#allocation11]  }
   0xc   :  { %s114_s30 = sshll.u32 %s1908_s4, 4  ;;  %s26_s13 = sshll.u32 %s2110_s1, 4  ;;  %s115_s30 = int_to_ptr.vmem [resolvable:$true] %s114_s30  ;;  %s27_s13 = int_to_ptr.hbm [resolvable:$true] %s26_s13 }
   0xd   :  { %117 = dma.hbm_to_vmem [thread:$0]  %s113_s27, 16, %s115_s30, [#allocation14]  }
   0xe   :  { %s1909_s6 = smov [#allocation2]   ;;  %s50_s8 = sshll.u32 %s2112_s3, 4  ;;  %s51_s8 = int_to_ptr.hbm [resolvable:$true] %s50_s8 }
   0xf   :  { %s28_s14 = sshll.u32 %s1909_s6, 4  ;;  %s1910_s17 = smov 1536   ;;  %s29_s14 = int_to_ptr.vmem [resolvable:$true] %s28_s14 }
  0x10   :  { %s1911_s18 = smov 96   ;;  %s1912_s19 = smov [#allocation6]  }
  0x11   :  { %34 = dma.hbm_to_vmem [thread:$0]  %s27_s13, 49152, %s29_s14, [#allocation3], %s1910_s17, %s1910_s17, %s1911_s18  }
  0x12   :  { %s52_s20 = sshll.u32 %s1912_s19, 4  ;;  %s1913_s21 = smov 512   ;;  %s53_s20 = int_to_ptr.vmem [resolvable:$true] %s52_s20 }
  0x13   :  { %s1914_s22 = smov 32   ;;  %s74_s24 = sshll.u32 %s2114_s5, 4  ;;  %s75_s24 = int_to_ptr.hbm [resolvable:$true] %s74_s24 }
  0x14   :  { %58 = dma.hbm_to_vmem [thread:$0]  %s51_s8, 24576, %s53_s20, [#allocation5], %s1913_s21, %s1913_s21, %s1914_s22  }
  0x15   :  { %s1915_s25 = smov [#allocation9]   ;;  %s98_s27 = sshll.u32 %s2116_s7, 4  ;;  %s99_s27 = int_to_ptr.hbm [resolvable:$true] %s98_s27 }
  0x16   :  { %s76_s2 = sshll.u32 %s1915_s25, 4  ;;  %s1916_s28 = smov 128   ;;  %s77_s2 = int_to_ptr.vmem [resolvable:$true] %s76_s2 }
  0x17   :  { %s1917_s29 = smov 8   ;;  %s1918_s4 = smov [#allocation12]  }
  0x18   :  { %82 = dma.hbm_to_vmem [thread:$0]  %s75_s24, 2048, %s77_s2, [#allocation8], %s1916_s28, %s1916_s28, %s1917_s29  }
  0x19   :  { %s100_s30 = sshll.u32 %s1918_s4, 4  ;;  %s123_s13 = sshll.u32 %s2118_s9, 4  ;;  %s101_s30 = int_to_ptr.vmem [resolvable:$true] %s100_s30  ;;  %s124_s13 = int_to_ptr.hbm [resolvable:$true] %s123_s13 }
  0x1a   :  { %106 = dma.hbm_to_vmem [thread:$0]  %s99_s27, 2048, %s101_s30, [#allocation11], %s1916_s28, %s1916_s28, %s1917_s29  }
  0x1b   :  { %s1919_s5 = smov [#allocation15]  }
  0x1c   :  { %s125_s6 = sshll.u32 %s1919_s5, 4  ;;  %s126_s6 = int_to_ptr.vmem [resolvable:$true] %s125_s6 }
  0x1d   :  { %128 = dma.hbm_to_vmem [thread:$0]  %s124_s13, 16, %s126_s6, [#allocation14]  }
  0x1e   :  { %1895 = dma.done.wait [#allocation3], 49152  }
  0x1f   :  { %1896 = vsyncadd [#allocation3], 4294918144 }
  0x20   :  { %1897 = dma.done.wait [#allocation5], 24768  }
  0x21   :  { %1898 = vsyncadd [#allocation5], 4294942528 }
  0x22   :  { %1899 = dma.done.wait [#allocation8], 2112  }
  0x23   :  { %1900 = vsyncadd [#allocation8], 4294965184 }
  0x24   :  { %1901 = dma.done.wait [#allocation11], 2064  }
  0x25   :  { %1902 = vsyncadd [#allocation11], 4294965232 }
  0x26   :  { %1903 = dma.done.wait [#allocation14], 32  }
  0x27   :  { %1904 = vsyncadd [#allocation14], 4294967264  ;;  %v347_v0 = vld [vmem:[#allocation2 + $0x5a0] sm:$0xff]  ;;  %v348_v1 = vld [vmem:[#allocation2 + $0x5a8] sm:$0xff] }
  0x28   :  { %v335_v2 = vld [vmem:[#allocation2 + $0x540] sm:$0xff]  ;;  %579 = vmatpush.msra.mxu0 %v347_v0  ;;  %619 = vmatpush.msra.mxu2 %v348_v1  ;;  %v336_v4 = vld [vmem:[#allocation2 + $0x548] sm:$0xff]  ;;  %v349_v62 = vld [vmem:[#allocation2 + $0x5b0] sm:$0xff] }
  0x29   :  { %v539_v3 = vld [vmem:[#allocation2 + $0xba0] sm:$0xff]  ;;  %v540_v5 = vld [vmem:[#allocation2 + $0xba8] sm:$0xff]  ;;  %v350_v63 = vld [vmem:[#allocation2 + $0x5b8] sm:$0xff] }
  0x2a   :  { %599 = vmatpush.msra.mxu1 %v539_v3  ;;  %639 = vmatpush.msra.mxu3 %v540_v5  ;;  %v323_v6 = vld [vmem:[#allocation2 + $0x4e0] sm:$0xff]  ;;  %v324_v8 = vld [vmem:[#allocation2 + $0x4e8] sm:$0xff]  ;;  %v541_v3 = vld [vmem:[#allocation2 + $0xbb0] sm:$0xff] }
  0x2b   :  { %v527_v7 = vld [vmem:[#allocation2 + $0xb40] sm:$0xff]  ;;  %580 = vmatpush.msra.mxu0 %v335_v2  ;;  %620 = vmatpush.msra.mxu2 %v336_v4  ;;  %v528_v9 = vld [vmem:[#allocation2 + $0xb48] sm:$0xff]  ;;  %v337_v2 = vld [vmem:[#allocation2 + $0x550] sm:$0xff] }
  0x2c   :  { %v515_v10 = vld [vmem:[#allocation2 + $0xae0] sm:$0xff]  ;;  %600 = vmatpush.msra.mxu1 %v527_v7  ;;  %640 = vmatpush.msra.mxu3 %v528_v9  ;;  %v312_v12 = vld [vmem:[#allocation2 + $0x488] sm:$0xff]  ;;  %v338_v4 = vld [vmem:[#allocation2 + $0x558] sm:$0xff] }
  0x2d   :  { %v311_v11 = vld [vmem:[#allocation2 + $0x480] sm:$0xff]  ;;  %v516_v13 = vld [vmem:[#allocation2 + $0xae8] sm:$0xff]  ;;  %581 = vmatpush.msra.mxu0 %v323_v6  ;;  %621 = vmatpush.msra.mxu2 %v324_v8  ;;  %v542_v5 = vld [vmem:[#allocation2 + $0xbb8] sm:$0xff] }
  0x2e   :  { %v503_v14 = vld [vmem:[#allocation2 + $0xa80] sm:$0xff]  ;;  %v504_v15 = vld [vmem:[#allocation2 + $0xa88] sm:$0xff]  ;;  %601 = vmatpush.msra.mxu1 %v515_v10  ;;  %641 = vmatpush.msra.mxu3 %v516_v13  ;;  %v325_v6 = vld [vmem:[#allocation2 + $0x4f0] sm:$0xff] }
  0x2f   :  { %v299_v16 = vld [vmem:[#allocation2 + $0x420] sm:$0xff]  ;;  %v300_v17 = vld [vmem:[#allocation2 + $0x428] sm:$0xff]  ;;  %582 = vmatpush.msra.mxu0 %v311_v11  ;;  %622 = vmatpush.msra.mxu2 %v312_v12  ;;  %v529_v7 = vld [vmem:[#allocation2 + $0xb50] sm:$0xff] }
  0x30   :  { %v491_v18 = vld [vmem:[#allocation2 + $0xa20] sm:$0xff]  ;;  %v492_v19 = vld [vmem:[#allocation2 + $0xa28] sm:$0xff]  ;;  %602 = vmatpush.msra.mxu1 %v503_v14  ;;  %642 = vmatpush.msra.mxu3 %v504_v15  ;;  %v326_v8 = vld [vmem:[#allocation2 + $0x4f8] sm:$0xff] }
  0x31   :  { %v287_v20 = vld [vmem:[#allocation2 + $0x3c0] sm:$0xff]  ;;  %v288_v21 = vld [vmem:[#allocation2 + $0x3c8] sm:$0xff]  ;;  %583 = vmatpush.msra.mxu0 %v299_v16  ;;  %623 = vmatpush.msra.mxu2 %v300_v17  ;;  %v530_v9 = vld [vmem:[#allocation2 + $0xb58] sm:$0xff] }
  0x32   :  { %v479_v22 = vld [vmem:[#allocation2 + $0x9c0] sm:$0xff]  ;;  %v480_v23 = vld [vmem:[#allocation2 + $0x9c8] sm:$0xff]  ;;  %603 = vmatpush.msra.mxu1 %v491_v18  ;;  %643 = vmatpush.msra.mxu3 %v492_v19  ;;  %v313_v10 = vld [vmem:[#allocation2 + $0x490] sm:$0xff] }
  0x33   :  { %v275_v24 = vld [vmem:[#allocation2 + $0x360] sm:$0xff]  ;;  %v276_v25 = vld [vmem:[#allocation2 + $0x368] sm:$0xff]  ;;  %584 = vmatpush.msra.mxu0 %v287_v20  ;;  %624 = vmatpush.msra.mxu2 %v288_v21  ;;  %v517_v11 = vld [vmem:[#allocation2 + $0xaf0] sm:$0xff] }
  0x34   :  { %v467_v26 = vld [vmem:[#allocation2 + $0x960] sm:$0xff]  ;;  %v468_v27 = vld [vmem:[#allocation2 + $0x968] sm:$0xff]  ;;  %604 = vmatpush.msra.mxu1 %v479_v22  ;;  %644 = vmatpush.msra.mxu3 %v480_v23  ;;  %v314_v12 = vld [vmem:[#allocation2 + $0x498] sm:$0xff] }
  0x35   :  { %v263_v28 = vld [vmem:[#allocation2 + $0x300] sm:$0xff]  ;;  %v264_v29 = vld [vmem:[#allocation2 + $0x308] sm:$0xff]  ;;  %585 = vmatpush.msra.mxu0 %v275_v24  ;;  %625 = vmatpush.msra.mxu2 %v276_v25  ;;  %v518_v13 = vld [vmem:[#allocation2 + $0xaf8] sm:$0xff] }
  0x36   :  { %v455_v30 = vld [vmem:[#allocation2 + $0x900] sm:$0xff]  ;;  %v456_v31 = vld [vmem:[#allocation2 + $0x908] sm:$0xff]  ;;  %605 = vmatpush.msra.mxu1 %v467_v26  ;;  %645 = vmatpush.msra.mxu3 %v468_v27  ;;  %v301_v14 = vld [vmem:[#allocation2 + $0x430] sm:$0xff] }
  0x37   :  { %v251_v32 = vld [vmem:[#allocation2 + $0x2a0] sm:$0xff]  ;;  %v252_v33 = vld [vmem:[#allocation2 + $0x2a8] sm:$0xff]  ;;  %586 = vmatpush.msra.mxu0 %v263_v28  ;;  %626 = vmatpush.msra.mxu2 %v264_v29  ;;  %v505_v15 = vld [vmem:[#allocation2 + $0xa90] sm:$0xff] }
  0x38   :  { %v443_v34 = vld [vmem:[#allocation2 + $0x8a0] sm:$0xff]  ;;  %v444_v35 = vld [vmem:[#allocation2 + $0x8a8] sm:$0xff]  ;;  %606 = vmatpush.msra.mxu1 %v455_v30  ;;  %646 = vmatpush.msra.mxu3 %v456_v31  ;;  %v302_v16 = vld [vmem:[#allocation2 + $0x438] sm:$0xff] }
  0x39   :  { %v239_v36 = vld [vmem:[#allocation2 + $0x240] sm:$0xff]  ;;  %v240_v37 = vld [vmem:[#allocation2 + $0x248] sm:$0xff]  ;;  %587 = vmatpush.msra.mxu0 %v251_v32  ;;  %627 = vmatpush.msra.mxu2 %v252_v33  ;;  %v506_v17 = vld [vmem:[#allocation2 + $0xa98] sm:$0xff] }
  0x3a   :  { %v431_v38 = vld [vmem:[#allocation2 + $0x840] sm:$0xff]  ;;  %v432_v39 = vld [vmem:[#allocation2 + $0x848] sm:$0xff]  ;;  %607 = vmatpush.msra.mxu1 %v443_v34  ;;  %647 = vmatpush.msra.mxu3 %v444_v35  ;;  %v289_v18 = vld [vmem:[#allocation2 + $0x3d0] sm:$0xff] }
  0x3b   :  { %v227_v40 = vld [vmem:[#allocation2 + $0x1e0] sm:$0xff]  ;;  %v228_v41 = vld [vmem:[#allocation2 + $0x1e8] sm:$0xff]  ;;  %588 = vmatpush.msra.mxu0 %v239_v36  ;;  %628 = vmatpush.msra.mxu2 %v240_v37  ;;  %v493_v19 = vld [vmem:[#allocation2 + $0xa30] sm:$0xff] }
  0x3c   :  { %v419_v42 = vld [vmem:[#allocation2 + $0x7e0] sm:$0xff]  ;;  %v420_v43 = vld [vmem:[#allocation2 + $0x7e8] sm:$0xff]  ;;  %608 = vmatpush.msra.mxu1 %v431_v38  ;;  %648 = vmatpush.msra.mxu3 %v432_v39  ;;  %v290_v20 = vld [vmem:[#allocation2 + $0x3d8] sm:$0xff] }
  0x3d   :  { %v215_v44 = vld [vmem:[#allocation2 + $0x180] sm:$0xff]  ;;  %v216_v45 = vld [vmem:[#allocation2 + $0x188] sm:$0xff]  ;;  %589 = vmatpush.msra.mxu0 %v227_v40  ;;  %629 = vmatpush.msra.mxu2 %v228_v41  ;;  %v494_v21 = vld [vmem:[#allocation2 + $0xa38] sm:$0xff] }
  0x3e   :  { %v407_v46 = vld [vmem:[#allocation2 + $0x780] sm:$0xff]  ;;  %v408_v47 = vld [vmem:[#allocation2 + $0x788] sm:$0xff]  ;;  %609 = vmatpush.msra.mxu1 %v419_v42  ;;  %649 = vmatpush.msra.mxu3 %v420_v43  ;;  %v277_v22 = vld [vmem:[#allocation2 + $0x370] sm:$0xff] }
  0x3f   :  { %v203_v48 = vld [vmem:[#allocation2 + $0x120] sm:$0xff]  ;;  %v204_v49 = vld [vmem:[#allocation2 + $0x128] sm:$0xff]  ;;  %590 = vmatpush.msra.mxu0 %v215_v44  ;;  %630 = vmatpush.msra.mxu2 %v216_v45  ;;  %v481_v23 = vld [vmem:[#allocation2 + $0x9d0] sm:$0xff] }
  0x40   :  { %v395_v50 = vld [vmem:[#allocation2 + $0x720] sm:$0xff]  ;;  %v396_v51 = vld [vmem:[#allocation2 + $0x728] sm:$0xff]  ;;  %610 = vmatpush.msra.mxu1 %v407_v46  ;;  %650 = vmatpush.msra.mxu3 %v408_v47  ;;  %v278_v24 = vld [vmem:[#allocation2 + $0x378] sm:$0xff] }
  0x41   :  { %v191_v52 = vld [vmem:[#allocation2 + $0xc0] sm:$0xff]  ;;  %v192_v53 = vld [vmem:[#allocation2 + $0xc8] sm:$0xff]  ;;  %591 = vmatpush.msra.mxu0 %v203_v48  ;;  %631 = vmatpush.msra.mxu2 %v204_v49  ;;  %v482_v25 = vld [vmem:[#allocation2 + $0x9d8] sm:$0xff] }
  0x42   :  { %v383_v54 = vld [vmem:[#allocation2 + $0x6c0] sm:$0xff]  ;;  %v384_v55 = vld [vmem:[#allocation2 + $0x6c8] sm:$0xff]  ;;  %611 = vmatpush.msra.mxu1 %v395_v50  ;;  %651 = vmatpush.msra.mxu3 %v396_v51  ;;  %v265_v26 = vld [vmem:[#allocation2 + $0x310] sm:$0xff] }
  0x43   :  { %v179_v56 = vld [vmem:[#allocation2 + $0x60] sm:$0xff]  ;;  %v180_v57 = vld [vmem:[#allocation2 + $0x68] sm:$0xff]  ;;  %592 = vmatpush.msra.mxu0 %v191_v52  ;;  %632 = vmatpush.msra.mxu2 %v192_v53  ;;  %v469_v27 = vld [vmem:[#allocation2 + $0x970] sm:$0xff] }
  0x44   :  { %v371_v58 = vld [vmem:[#allocation2 + $0x660] sm:$0xff]  ;;  %v372_v59 = vld [vmem:[#allocation2 + $0x668] sm:$0xff]  ;;  %612 = vmatpush.msra.mxu1 %v383_v54  ;;  %652 = vmatpush.msra.mxu3 %v384_v55  ;;  %v266_v28 = vld [vmem:[#allocation2 + $0x318] sm:$0xff] }
  0x45   :  { %v167_v60 = vld [vmem:[#allocation2] sm:$0xff]  ;;  %v168_v61 = vld [vmem:[#allocation2 + $0x8] sm:$0xff]  ;;  %593 = vmatpush.msra.mxu0 %v179_v56  ;;  %633 = vmatpush.msra.mxu2 %v180_v57  ;;  %v470_v29 = vld [vmem:[#allocation2 + $0x978] sm:$0xff] }
  0x46   :  { %613 = vmatpush.msra.mxu1 %v371_v58  ;;  %653 = vmatpush.msra.mxu3 %v372_v59  ;;  %v359_v0 = vld [vmem:[#allocation2 + $0x600] sm:$0xff]  ;;  %v360_v1 = vld [vmem:[#allocation2 + $0x608] sm:$0xff]  ;;  %v253_v30 = vld [vmem:[#allocation2 + $0x2b0] sm:$0xff] }
  0x47   :  { %594 = vmatpush.msra.mxu0 %v167_v60  ;;  %634 = vmatpush.msra.mxu2 %v168_v61  ;;  %v457_v31 = vld [vmem:[#allocation2 + $0x910] sm:$0xff]  ;;  %v254_v32 = vld [vmem:[#allocation2 + $0x2b8] sm:$0xff]  ;;  %v2005_v54 = vld [vmem:[%s2109_s0] sm:$0xff] }
  0x48   :  { %614 = vmatpush.msra.mxu1 %v359_v0  ;;  %654 = vmatpush.msra.mxu3 %v360_v1  ;;  %v458_v33 = vld [vmem:[#allocation2 + $0x918] sm:$0xff]  ;;  %v241_v34 = vld [vmem:[#allocation2 + $0x250] sm:$0xff]  ;;  %v2010_v59 = vld [vmem:[%s2109_s0 + $0x8] sm:$0xff] }
  0x49   :  { %659 = vmatpush.msrb.mxu0 %v349_v62  ;;  %699 = vmatpush.msrb.mxu2 %v350_v63  ;;  %v445_v35 = vld [vmem:[#allocation2 + $0x8b0] sm:$0xff]  ;;  %v242_v36 = vld [vmem:[#allocation2 + $0x258] sm:$0xff]  ;;  %v352_v0 = vld [vmem:[#allocation2 + $0x5c8] sm:$0xff] }
  0x4a   :  { %679 = vmatpush.msrb.mxu1 %v541_v3  ;;  %719 = vmatpush.msrb.mxu3 %v542_v5  ;;  %v446_v37 = vld [vmem:[#allocation2 + $0x8b8] sm:$0xff]  ;;  %v229_v38 = vld [vmem:[#allocation2 + $0x1f0] sm:$0xff]  ;;  %v351_v1 = vld [vmem:[#allocation2 + $0x5c0] sm:$0xff] }
  0x4b   :  { %660 = vmatpush.msrb.mxu0 %v337_v2  ;;  %700 = vmatpush.msrb.mxu2 %v338_v4  ;;  %v433_v39 = vld [vmem:[#allocation2 + $0x850] sm:$0xff]  ;;  %v230_v40 = vld [vmem:[#allocation2 + $0x1f8] sm:$0xff]  ;;  %v339_v4 = vld [vmem:[#allocation2 + $0x560] sm:$0xff] }
  0x4c   :  { %680 = vmatpush.msrb.mxu1 %v529_v7  ;;  %720 = vmatpush.msrb.mxu3 %v530_v9  ;;  %v434_v41 = vld [vmem:[#allocation2 + $0x858] sm:$0xff]  ;;  %v217_v42 = vld [vmem:[#allocation2 + $0x190] sm:$0xff]  ;;  %v543_v5 = vld [vmem:[#allocation2 + $0xbc0] sm:$0xff] }
  0x4d   :  { %661 = vmatpush.msrb.mxu0 %v325_v6  ;;  %701 = vmatpush.msrb.mxu2 %v326_v8  ;;  %v421_v43 = vld [vmem:[#allocation2 + $0x7f0] sm:$0xff]  ;;  %v218_v44 = vld [vmem:[#allocation2 + $0x198] sm:$0xff]  ;;  %v340_v6 = vld [vmem:[#allocation2 + $0x568] sm:$0xff] }
  0x4e   :  { %681 = vmatpush.msrb.mxu1 %v517_v11  ;;  %721 = vmatpush.msrb.mxu3 %v518_v13  ;;  %v422_v45 = vld [vmem:[#allocation2 + $0x7f8] sm:$0xff]  ;;  %v205_v46 = vld [vmem:[#allocation2 + $0x130] sm:$0xff]  ;;  %v544_v7 = vld [vmem:[#allocation2 + $0xbc8] sm:$0xff] }
  0x4f   :  { %662 = vmatpush.msrb.mxu0 %v313_v10  ;;  %702 = vmatpush.msrb.mxu2 %v314_v12  ;;  %v409_v47 = vld [vmem:[#allocation2 + $0x790] sm:$0xff]  ;;  %v206_v48 = vld [vmem:[#allocation2 + $0x138] sm:$0xff]  ;;  %v327_v8 = vld [vmem:[#allocation2 + $0x500] sm:$0xff] }
  0x50   :  { %682 = vmatpush.msrb.mxu1 %v505_v15  ;;  %722 = vmatpush.msrb.mxu3 %v506_v17  ;;  %v410_v49 = vld [vmem:[#allocation2 + $0x798] sm:$0xff]  ;;  %v193_v50 = vld [vmem:[#allocation2 + $0xd0] sm:$0xff]  ;;  %v531_v9 = vld [vmem:[#allocation2 + $0xb60] sm:$0xff] }
  0x51   :  { %663 = vmatpush.msrb.mxu0 %v301_v14  ;;  %703 = vmatpush.msrb.mxu2 %v302_v16  ;;  %v397_v51 = vld [vmem:[#allocation2 + $0x730] sm:$0xff]  ;;  %v194_v52 = vld [vmem:[#allocation2 + $0xd8] sm:$0xff]  ;;  %v328_v10 = vld [vmem:[#allocation2 + $0x508] sm:$0xff] }
  0x52   :  { %683 = vmatpush.msrb.mxu1 %v493_v19  ;;  %723 = vmatpush.msrb.mxu3 %v494_v21  ;;  %v398_v53 = vld [vmem:[#allocation2 + $0x738] sm:$0xff]  ;;  %v181_v55 = vld [vmem:[#allocation2 + $0x70] sm:$0xff]  ;;  %v532_v11 = vld [vmem:[#allocation2 + $0xb68] sm:$0xff] }
  0x53   :  { %664 = vmatpush.msrb.mxu0 %v289_v18  ;;  %704 = vmatpush.msrb.mxu2 %v290_v20  ;;  %v385_v56 = vld [vmem:[#allocation2 + $0x6d0] sm:$0xff]  ;;  %v182_v57 = vld [vmem:[#allocation2 + $0x78] sm:$0xff]  ;;  %v315_v12 = vld [vmem:[#allocation2 + $0x4a0] sm:$0xff] }
  0x54   :  { %684 = vmatpush.msrb.mxu1 %v481_v23  ;;  %724 = vmatpush.msrb.mxu3 %v482_v25  ;;  %v386_v58 = vld [vmem:[#allocation2 + $0x6d8] sm:$0xff]  ;;  %v169_v60 = vld [vmem:[#allocation2 + $0x10] sm:$0xff]  ;;  %v519_v13 = vld [vmem:[#allocation2 + $0xb00] sm:$0xff] }
  0x55   :  { %665 = vmatpush.msrb.mxu0 %v277_v22  ;;  %705 = vmatpush.msrb.mxu2 %v278_v24  ;;  %v373_v61 = vld [vmem:[#allocation2 + $0x670] sm:$0xff]  ;;  %v170_v62 = vld [vmem:[#allocation2 + $0x18] sm:$0xff]  ;;  %v316_v14 = vld [vmem:[#allocation2 + $0x4a8] sm:$0xff] }
  0x56   :  { %685 = vmatpush.msrb.mxu1 %v469_v27  ;;  %725 = vmatpush.msrb.mxu3 %v470_v29  ;;  %v374_v63 = vld [vmem:[#allocation2 + $0x678] sm:$0xff]  ;;  %v361_v2 = vld [vmem:[#allocation2 + $0x610] sm:$0xff]  ;;  %v520_v15 = vld [vmem:[#allocation2 + $0xb08] sm:$0xff] }
  0x57   :  { %666 = vmatpush.msrb.mxu0 %v265_v26  ;;  %706 = vmatpush.msrb.mxu2 %v266_v28  ;;  %v362_v3 = vld [vmem:[#allocation2 + $0x618] sm:$0xff]  ;;  %v303_v16 = vld [vmem:[#allocation2 + $0x440] sm:$0xff]  ;;  %v304_v18 = vld [vmem:[#allocation2 + $0x448] sm:$0xff] }
  0x58   :  { %686 = vmatpush.msrb.mxu1 %v457_v31  ;;  %726 = vmatpush.msrb.mxu3 %v458_v33  ;;  %v507_v17 = vld [vmem:[#allocation2 + $0xaa0] sm:$0xff]  ;;  %v508_v19 = vld [vmem:[#allocation2 + $0xaa8] sm:$0xff] }
  0x59   :  { %667 = vmatpush.msrb.mxu0 %v253_v30  ;;  %707 = vmatpush.msrb.mxu2 %v254_v32  ;;  %v291_v20 = vld [vmem:[#allocation2 + $0x3e0] sm:$0xff]  ;;  %v292_v22 = vld [vmem:[#allocation2 + $0x3e8] sm:$0xff] }
  0x5a   :  { %687 = vmatpush.msrb.mxu1 %v445_v35  ;;  %727 = vmatpush.msrb.mxu3 %v446_v37  ;;  %v495_v21 = vld [vmem:[#allocation2 + $0xa40] sm:$0xff]  ;;  %v496_v23 = vld [vmem:[#allocation2 + $0xa48] sm:$0xff] }
  0x5b   :  { %668 = vmatpush.msrb.mxu0 %v241_v34  ;;  %708 = vmatpush.msrb.mxu2 %v242_v36  ;;  %v279_v24 = vld [vmem:[#allocation2 + $0x380] sm:$0xff]  ;;  %v280_v26 = vld [vmem:[#allocation2 + $0x388] sm:$0xff] }
  0x5c   :  { %688 = vmatpush.msrb.mxu1 %v433_v39  ;;  %728 = vmatpush.msrb.mxu3 %v434_v41  ;;  %v483_v25 = vld [vmem:[#allocation2 + $0x9e0] sm:$0xff]  ;;  %v484_v27 = vld [vmem:[#allocation2 + $0x9e8] sm:$0xff] }
  0x5d   :  { %669 = vmatpush.msrb.mxu0 %v229_v38  ;;  %709 = vmatpush.msrb.mxu2 %v230_v40  ;;  %v267_v28 = vld [vmem:[#allocation2 + $0x320] sm:$0xff]  ;;  %v268_v30 = vld [vmem:[#allocation2 + $0x328] sm:$0xff] }
  0x5e   :  { %689 = vmatpush.msrb.mxu1 %v421_v43  ;;  %729 = vmatpush.msrb.mxu3 %v422_v45  ;;  %v471_v29 = vld [vmem:[#allocation2 + $0x980] sm:$0xff]  ;;  %v472_v31 = vld [vmem:[#allocation2 + $0x988] sm:$0xff] }
  0x5f   :  { %670 = vmatpush.msrb.mxu0 %v217_v42  ;;  %710 = vmatpush.msrb.mxu2 %v218_v44  ;;  %v255_v32 = vld [vmem:[#allocation2 + $0x2c0] sm:$0xff]  ;;  %v256_v34 = vld [vmem:[#allocation2 + $0x2c8] sm:$0xff] }
  0x60   :  { %690 = vmatpush.msrb.mxu1 %v409_v47  ;;  %730 = vmatpush.msrb.mxu3 %v410_v49  ;;  %v459_v33 = vld [vmem:[#allocation2 + $0x920] sm:$0xff]  ;;  %v460_v35 = vld [vmem:[#allocation2 + $0x928] sm:$0xff] }
  0x61   :  { %671 = vmatpush.msrb.mxu0 %v205_v46  ;;  %711 = vmatpush.msrb.mxu2 %v206_v48  ;;  %v243_v36 = vld [vmem:[#allocation2 + $0x260] sm:$0xff]  ;;  %v244_v38 = vld [vmem:[#allocation2 + $0x268] sm:$0xff] }
  0x62   :  { %691 = vmatpush.msrb.mxu1 %v397_v51  ;;  %731 = vmatpush.msrb.mxu3 %v398_v53  ;;  %v447_v37 = vld [vmem:[#allocation2 + $0x8c0] sm:$0xff]  ;;  %v448_v39 = vld [vmem:[#allocation2 + $0x8c8] sm:$0xff] }
  0x63   :  { %672 = vmatpush.msrb.mxu0 %v193_v50  ;;  %712 = vmatpush.msrb.mxu2 %v194_v52  ;;  %v231_v40 = vld [vmem:[#allocation2 + $0x200] sm:$0xff]  ;;  %v232_v42 = vld [vmem:[#allocation2 + $0x208] sm:$0xff] }
  0x64   :  { %635 = vmatmul.f32.vlgmr.msra.gmra.mxu2 %v2005_v54  ;;  %692 = vmatpush.msrb.mxu1 %v385_v56  ;;  %v435_v41 = vld [vmem:[#allocation2 + $0x860] sm:$0xff]  ;;  %v436_v43 = vld [vmem:[#allocation2 + $0x868] sm:$0xff] }
  0x65   :  { %673 = vmatpush.msrb.mxu0 %v181_v55  ;;  %713 = vmatpush.msrb.mxu2 %v182_v57  ;;  %v219_v44 = vld [vmem:[#allocation2 + $0x1a0] sm:$0xff]  ;;  %v220_v46 = vld [vmem:[#allocation2 + $0x1a8] sm:$0xff] }
  0x66   :  { %732 = vmatpush.msrb.mxu3 %v386_v58  ;;  %693 = vmatpush.msrb.mxu1 %v373_v61  ;;  %v423_v45 = vld [vmem:[#allocation2 + $0x800] sm:$0xff]  ;;  %v424_v47 = vld [vmem:[#allocation2 + $0x808] sm:$0xff] }
  0x67   :  { %674 = vmatpush.msrb.mxu0 %v169_v60  ;;  %655 = vmatmul.f32.vlgmr.msra.gmra.mxu3 %v2010_v59  ;;  %v411_v48 = vld [vmem:[#allocation2 + $0x7a0] sm:$0xff]  ;;  %v208_v50 = vld [vmem:[#allocation2 + $0x148] sm:$0xff] }
  0x68   :  { %714 = vmatpush.msrb.mxu2 %v170_v62  ;;  %733 = vmatpush.msrb.mxu3 %v374_v63  ;;  %v207_v49 = vld [vmem:[#allocation2 + $0x140] sm:$0xff]  ;;  %v412_v51 = vld [vmem:[#allocation2 + $0x7a8] sm:$0xff] }
  0x69   :  { %595 = vmatmul.f32.vlgmr.msra.gmra.mxu0 %v2005_v54  ;;  %694 = vmatpush.msrb.mxu1 %v361_v2  ;;  %v195_v52 = vld [vmem:[#allocation2 + $0xe0] sm:$0xff]  ;;  %v196_v55 = vld [vmem:[#allocation2 + $0xe8] sm:$0xff]  ;;  %v354_v2 = vld [vmem:[#allocation2 + $0x5d8] sm:$0xff] }
  0x6a   :  { %779 = vmatpush.msra.mxu2 %v352_v0  ;;  %739 = vmatpush.msra.mxu0 %v351_v1  ;;  %v399_v53 = vld [vmem:[#allocation2 + $0x740] sm:$0xff]  ;;  %v400_v56 = vld [vmem:[#allocation2 + $0x748] sm:$0xff] }
  0x6b   :  { %734 = vmatpush.msrb.mxu3 %v362_v3  ;;  %615 = vmatmul.f32.vlgmr.msra.gmra.mxu1 %v2010_v59  ;;  %v183_v57 = vld [vmem:[#allocation2 + $0x80] sm:$0xff]  ;;  %v184_v60 = vld [vmem:[#allocation2 + $0x88] sm:$0xff]  ;;  %v353_v3 = vld [vmem:[#allocation2 + $0x5d0] sm:$0xff] }
  0x6c   :  { %740 = vmatpush.msra.mxu0 %v339_v4  ;;  %759 = vmatpush.msra.mxu1 %v543_v5  ;;  %v387_v58 = vld [vmem:[#allocation2 + $0x6e0] sm:$0xff]  ;;  %v388_v61 = vld [vmem:[#allocation2 + $0x6e8] sm:$0xff] }
  0x6d   :  { %780 = vmatpush.msra.mxu2 %v340_v6  ;;  %799 = vmatpush.msra.mxu3 %v544_v7  ;;  %v171_v62 = vld [vmem:[#allocation2 + $0x20] sm:$0xff]  ;;  %v172_v0 = vld [vmem:[#allocation2 + $0x28] sm:$0xff]  ;;  %v341_v6 = vld [vmem:[#allocation2 + $0x570] sm:$0xff] }
  0x6e   :  { %715 = vmatmul.f32.vlgmr.msrb.gmra.mxu2 %v2005_v54  ;;  %741 = vmatpush.msra.mxu0 %v327_v8  ;;  %v375_v63 = vld [vmem:[#allocation2 + $0x680] sm:$0xff]  ;;  %v376_v1 = vld [vmem:[#allocation2 + $0x688] sm:$0xff]  ;;  %v545_v7 = vld [vmem:[#allocation2 + $0xbd0] sm:$0xff] }
  0x6f   :  { %760 = vmatpush.msra.mxu1 %v531_v9  ;;  %781 = vmatpush.msra.mxu2 %v328_v10  ;;  %v363_v4 = vld [vmem:[#allocation2 + $0x620] sm:$0xff]  ;;  %v364_v5 = vld [vmem:[#allocation2 + $0x628] sm:$0xff]  ;;  %v342_v8 = vld [vmem:[#allocation2 + $0x578] sm:$0xff] }
  0x70   :  { %800 = vmatpush.msra.mxu3 %v532_v11  ;;  %742 = vmatpush.msra.mxu0 %v315_v12  ;;  %v546_v9 = vld [vmem:[#allocation2 + $0xbd8] sm:$0xff]  ;;  %v329_v10 = vld [vmem:[#allocation2 + $0x510] sm:$0xff] }
  0x71   :  { %735 = vmatmul.f32.vlgmr.msrb.gmra.mxu3 %v2010_v59  ;;  %761 = vmatpush.msra.mxu1 %v519_v13  ;;  %v533_v11 = vld [vmem:[#allocation2 + $0xb70] sm:$0xff]  ;;  %v330_v12 = vld [vmem:[#allocation2 + $0x518] sm:$0xff] }
  0x72   :  { %782 = vmatpush.msra.mxu2 %v316_v14  ;;  %801 = vmatpush.msra.mxu3 %v520_v15  ;;  %v534_v13 = vld [vmem:[#allocation2 + $0xb78] sm:$0xff]  ;;  %v317_v14 = vld [vmem:[#allocation2 + $0x4b0] sm:$0xff] }
  0x73   :  { %743 = vmatpush.msra.mxu0 %v303_v16  ;;  %762 = vmatpush.msra.mxu1 %v507_v17  ;;  %v521_v15 = vld [vmem:[#allocation2 + $0xb10] sm:$0xff]  ;;  %v318_v16 = vld [vmem:[#allocation2 + $0x4b8] sm:$0xff] }
  0x74   :  { %783 = vmatpush.msra.mxu2 %v304_v18  ;;  %802 = vmatpush.msra.mxu3 %v508_v19  ;;  %v522_v17 = vld [vmem:[#allocation2 + $0xb18] sm:$0xff]  ;;  %v305_v18 = vld [vmem:[#allocation2 + $0x450] sm:$0xff] }
  0x75   :  { %744 = vmatpush.msra.mxu0 %v291_v20  ;;  %763 = vmatpush.msra.mxu1 %v495_v21  ;;  %v509_v19 = vld [vmem:[#allocation2 + $0xab0] sm:$0xff]  ;;  %v306_v20 = vld [vmem:[#allocation2 + $0x458] sm:$0xff] }
  0x76   :  { %784 = vmatpush.msra.mxu2 %v292_v22  ;;  %803 = vmatpush.msra.mxu3 %v496_v23  ;;  %v510_v21 = vld [vmem:[#allocation2 + $0xab8] sm:$0xff]  ;;  %v293_v22 = vld [vmem:[#allocation2 + $0x3f0] sm:$0xff] }
  0x77   :  { %745 = vmatpush.msra.mxu0 %v279_v24  ;;  %764 = vmatpush.msra.mxu1 %v483_v25  ;;  %v497_v23 = vld [vmem:[#allocation2 + $0xa50] sm:$0xff]  ;;  %v294_v24 = vld [vmem:[#allocation2 + $0x3f8] sm:$0xff] }
  0x78   :  { %785 = vmatpush.msra.mxu2 %v280_v26  ;;  %804 = vmatpush.msra.mxu3 %v484_v27  ;;  %v498_v25 = vld [vmem:[#allocation2 + $0xa58] sm:$0xff]  ;;  %v281_v26 = vld [vmem:[#allocation2 + $0x390] sm:$0xff] }
  0x79   :  { %746 = vmatpush.msra.mxu0 %v267_v28  ;;  %765 = vmatpush.msra.mxu1 %v471_v29  ;;  %v485_v27 = vld [vmem:[#allocation2 + $0x9f0] sm:$0xff]  ;;  %v282_v28 = vld [vmem:[#allocation2 + $0x398] sm:$0xff] }
  0x7a   :  { %786 = vmatpush.msra.mxu2 %v268_v30  ;;  %805 = vmatpush.msra.mxu3 %v472_v31  ;;  %v486_v29 = vld [vmem:[#allocation2 + $0x9f8] sm:$0xff]  ;;  %v269_v30 = vld [vmem:[#allocation2 + $0x330] sm:$0xff] }
  0x7b   :  { %747 = vmatpush.msra.mxu0 %v255_v32  ;;  %766 = vmatpush.msra.mxu1 %v459_v33  ;;  %v473_v31 = vld [vmem:[#allocation2 + $0x990] sm:$0xff]  ;;  %v270_v32 = vld [vmem:[#allocation2 + $0x338] sm:$0xff] }
  0x7c   :  { %787 = vmatpush.msra.mxu2 %v256_v34  ;;  %806 = vmatpush.msra.mxu3 %v460_v35  ;;  %v474_v33 = vld [vmem:[#allocation2 + $0x998] sm:$0xff]  ;;  %v257_v34 = vld [vmem:[#allocation2 + $0x2d0] sm:$0xff] }
  0x7d   :  { %748 = vmatpush.msra.mxu0 %v243_v36  ;;  %767 = vmatpush.msra.mxu1 %v447_v37  ;;  %v461_v35 = vld [vmem:[#allocation2 + $0x930] sm:$0xff]  ;;  %v258_v36 = vld [vmem:[#allocation2 + $0x2d8] sm:$0xff] }
  0x7e   :  { %788 = vmatpush.msra.mxu2 %v244_v38  ;;  %807 = vmatpush.msra.mxu3 %v448_v39  ;;  %v462_v37 = vld [vmem:[#allocation2 + $0x938] sm:$0xff]  ;;  %v245_v38 = vld [vmem:[#allocation2 + $0x270] sm:$0xff] }
  0x7f   :  { %749 = vmatpush.msra.mxu0 %v231_v40  ;;  %768 = vmatpush.msra.mxu1 %v435_v41  ;;  %v449_v39 = vld [vmem:[#allocation2 + $0x8d0] sm:$0xff]  ;;  %v246_v40 = vld [vmem:[#allocation2 + $0x278] sm:$0xff] }
  0x80   :  { %789 = vmatpush.msra.mxu2 %v232_v42  ;;  %808 = vmatpush.msra.mxu3 %v436_v43  ;;  %v450_v41 = vld [vmem:[#allocation2 + $0x8d8] sm:$0xff]  ;;  %v233_v42 = vld [vmem:[#allocation2 + $0x210] sm:$0xff] }
  0x81   :  { %750 = vmatpush.msra.mxu0 %v219_v44  ;;  %769 = vmatpush.msra.mxu1 %v423_v45  ;;  %v437_v43 = vld [vmem:[#allocation2 + $0x870] sm:$0xff]  ;;  %v234_v44 = vld [vmem:[#allocation2 + $0x218] sm:$0xff] }
  0x82   :  { %790 = vmatpush.msra.mxu2 %v220_v46  ;;  %809 = vmatpush.msra.mxu3 %v424_v47  ;;  %v438_v45 = vld [vmem:[#allocation2 + $0x878] sm:$0xff]  ;;  %v221_v46 = vld [vmem:[#allocation2 + $0x1b0] sm:$0xff] }
  0x83   :  { %675 = vmatmul.f32.vlgmr.msrb.gmra.mxu0 %v2005_v54  ;;  %770 = vmatpush.msra.mxu1 %v411_v48  ;;  %v425_v47 = vld [vmem:[#allocation2 + $0x810] sm:$0xff]  ;;  %v222_v48 = vld [vmem:[#allocation2 + $0x1b8] sm:$0xff] }
  0x84   :  { %751 = vmatpush.msra.mxu0 %v207_v49  ;;  %791 = vmatpush.msra.mxu2 %v208_v50  ;;  %v426_v49 = vld [vmem:[#allocation2 + $0x818] sm:$0xff]  ;;  %v209_v50 = vld [vmem:[#allocation2 + $0x150] sm:$0xff] }
  0x85   :  { %810 = vmatpush.msra.mxu3 %v412_v51  ;;  %695 = vmatmul.f32.vlgmr.msrb.gmra.mxu1 %v2010_v59  ;;  %v413_v51 = vld [vmem:[#allocation2 + $0x7b0] sm:$0xff] }
  0x86   :  { %752 = vmatpush.msra.mxu0 %v195_v52  ;;  %771 = vmatpush.msra.mxu1 %v399_v53  ;;  %v210_v52 = vld [vmem:[#allocation2 + $0x158] sm:$0xff] }
  0x87   :  { %792 = vmatpush.msra.mxu2 %v196_v55  ;;  %811 = vmatpush.msra.mxu3 %v400_v56  ;;  %v414_v53 = vld [vmem:[#allocation2 + $0x7b8] sm:$0xff]  ;;  %v197_v55 = vld [vmem:[#allocation2 + $0xf0] sm:$0xff] }
  0x88   :  { %753 = vmatpush.msra.mxu0 %v183_v57  ;;  %772 = vmatpush.msra.mxu1 %v387_v58  ;;  %v401_v56 = vld [vmem:[#allocation2 + $0x750] sm:$0xff]  ;;  %v198_v57 = vld [vmem:[#allocation2 + $0xf8] sm:$0xff] }
  0x89   :  { %793 = vmatpush.msra.mxu2 %v184_v60  ;;  %812 = vmatpush.msra.mxu3 %v388_v61  ;;  %v402_v58 = vld [vmem:[#allocation2 + $0x758] sm:$0xff]  ;;  %v185_v60 = vld [vmem:[#allocation2 + $0x90] sm:$0xff] }
  0x8a   :  { %754 = vmatpush.msra.mxu0 %v171_v62  ;;  %773 = vmatpush.msra.mxu1 %v375_v63  ;;  %v389_v61 = vld [vmem:[#allocation2 + $0x6f0] sm:$0xff]  ;;  %v186_v62 = vld [vmem:[#allocation2 + $0x98] sm:$0xff] }
  0x8b   :  { %794 = vmatpush.msra.mxu2 %v172_v0  ;;  %813 = vmatpush.msra.mxu3 %v376_v1  ;;  %v390_v63 = vld [vmem:[#allocation2 + $0x6f8] sm:$0xff]  ;;  %v173_v0 = vld [vmem:[#allocation2 + $0x30] sm:$0xff] }
  0x8c   :  { %755 = vmatmul.f32.vlgmr.msra.gmra.mxu0 %v2005_v54  ;;  %774 = vmatpush.msra.mxu1 %v363_v4  ;;  %v377_v1 = vld [vmem:[#allocation2 + $0x690] sm:$0xff]  ;;  %v355_v4 = vld [vmem:[#allocation2 + $0x5e0] sm:$0xff] }
  0x8d   :  { %859 = vmatpush.msrb.mxu2 %v354_v2  ;;  %819 = vmatpush.msrb.mxu0 %v353_v3  ;;  %v174_v2 = vld [vmem:[#allocation2 + $0x38] sm:$0xff] }
  0x8e   :  { %814 = vmatpush.msra.mxu3 %v364_v5  ;;  %775 = vmatmul.f32.vlgmr.msra.gmra.mxu1 %v2010_v59  ;;  %v378_v3 = vld [vmem:[#allocation2 + $0x698] sm:$0xff]  ;;  %v356_v5 = vld [vmem:[#allocation2 + $0x5e8] sm:$0xff] }
  0x8f   :  { %820 = vmatpush.msrb.mxu0 %v341_v6  ;;  %839 = vmatpush.msrb.mxu1 %v545_v7  ;;  %v365_v6 = vld [vmem:[#allocation2 + $0x630] sm:$0xff]  ;;  %v366_v7 = vld [vmem:[#allocation2 + $0x638] sm:$0xff] }
  0x90   :  { %860 = vmatpush.msrb.mxu2 %v342_v8  ;;  %879 = vmatpush.msrb.mxu3 %v546_v9  ;;  %v343_v8 = vld [vmem:[#allocation2 + $0x580] sm:$0xff] }
  0x91   :  { %795 = vmatmul.f32.vlgmr.msra.gmra.mxu2 %v2005_v54  ;;  %821 = vmatpush.msrb.mxu0 %v329_v10  ;;  %v547_v9 = vld [vmem:[#allocation2 + $0xbe0] sm:$0xff]  ;;  %v344_v10 = vld [vmem:[#allocation2 + $0x588] sm:$0xff] }
  0x92   :  { %840 = vmatpush.msrb.mxu1 %v533_v11  ;;  %861 = vmatpush.msrb.mxu2 %v330_v12  ;;  %v548_v11 = vld [vmem:[#allocation2 + $0xbe8] sm:$0xff]  ;;  %v331_v12 = vld [vmem:[#allocation2 + $0x520] sm:$0xff] }
  0x93   :  { %880 = vmatpush.msrb.mxu3 %v534_v13  ;;  %822 = vmatpush.msrb.mxu0 %v317_v14  ;;  %v535_v13 = vld [vmem:[#allocation2 + $0xb80] sm:$0xff]  ;;  %v332_v14 = vld [vmem:[#allocation2 + $0x528] sm:$0xff] }
  0x94   :  { %815 = vmatmul.f32.vlgmr.msra.gmra.mxu3 %v2010_v59  ;;  %841 = vmatpush.msrb.mxu1 %v521_v15  ;;  %v536_v15 = vld [vmem:[#allocation2 + $0xb88] sm:$0xff] }
  0x95   :  { %862 = vmatpush.msrb.mxu2 %v318_v16  ;;  %881 = vmatpush.msrb.mxu3 %v522_v17  ;;  %v319_v16 = vld [vmem:[#allocation2 + $0x4c0] sm:$0xff] }
  0x96   :  { %823 = vmatpush.msrb.mxu0 %v305_v18  ;;  %842 = vmatpush.msrb.mxu1 %v509_v19  ;;  %v523_v17 = vld [vmem:[#allocation2 + $0xb20] sm:$0xff]  ;;  %v320_v18 = vld [vmem:[#allocation2 + $0x4c8] sm:$0xff] }
  0x97   :  { %863 = vmatpush.msrb.mxu2 %v306_v20  ;;  %882 = vmatpush.msrb.mxu3 %v510_v21  ;;  %v524_v19 = vld [vmem:[#allocation2 + $0xb28] sm:$0xff]  ;;  %v307_v20 = vld [vmem:[#allocation2 + $0x460] sm:$0xff] }
  0x98   :  { %824 = vmatpush.msrb.mxu0 %v293_v22  ;;  %843 = vmatpush.msrb.mxu1 %v497_v23  ;;  %v511_v21 = vld [vmem:[#allocation2 + $0xac0] sm:$0xff]  ;;  %v308_v22 = vld [vmem:[#allocation2 + $0x468] sm:$0xff] }
  0x99   :  { %864 = vmatpush.msrb.mxu2 %v294_v24  ;;  %883 = vmatpush.msrb.mxu3 %v498_v25  ;;  %v512_v23 = vld [vmem:[#allocation2 + $0xac8] sm:$0xff]  ;;  %v295_v24 = vld [vmem:[#allocation2 + $0x400] sm:$0xff] }
  0x9a   :  { %825 = vmatpush.msrb.mxu0 %v281_v26  ;;  %844 = vmatpush.msrb.mxu1 %v485_v27  ;;  %v499_v25 = vld [vmem:[#allocation2 + $0xa60] sm:$0xff]  ;;  %v296_v26 = vld [vmem:[#allocation2 + $0x408] sm:$0xff] }
  0x9b   :  { %865 = vmatpush.msrb.mxu2 %v282_v28  ;;  %884 = vmatpush.msrb.mxu3 %v486_v29  ;;  %v500_v27 = vld [vmem:[#allocation2 + $0xa68] sm:$0xff]  ;;  %v283_v28 = vld [vmem:[#allocation2 + $0x3a0] sm:$0xff] }
  0x9c   :  { %826 = vmatpush.msrb.mxu0 %v269_v30  ;;  %845 = vmatpush.msrb.mxu1 %v473_v31  ;;  %v487_v29 = vld [vmem:[#allocation2 + $0xa00] sm:$0xff]  ;;  %v284_v30 = vld [vmem:[#allocation2 + $0x3a8] sm:$0xff] }
  0x9d   :  { %866 = vmatpush.msrb.mxu2 %v270_v32  ;;  %885 = vmatpush.msrb.mxu3 %v474_v33  ;;  %v488_v31 = vld [vmem:[#allocation2 + $0xa08] sm:$0xff]  ;;  %v271_v32 = vld [vmem:[#allocation2 + $0x340] sm:$0xff] }
  0x9e   :  { %827 = vmatpush.msrb.mxu0 %v257_v34  ;;  %846 = vmatpush.msrb.mxu1 %v461_v35  ;;  %v475_v33 = vld [vmem:[#allocation2 + $0x9a0] sm:$0xff]  ;;  %v272_v34 = vld [vmem:[#allocation2 + $0x348] sm:$0xff] }
  0x9f   :  { %867 = vmatpush.msrb.mxu2 %v258_v36  ;;  %886 = vmatpush.msrb.mxu3 %v462_v37  ;;  %v476_v35 = vld [vmem:[#allocation2 + $0x9a8] sm:$0xff]  ;;  %v259_v36 = vld [vmem:[#allocation2 + $0x2e0] sm:$0xff] }
  0xa0   :  { %828 = vmatpush.msrb.mxu0 %v245_v38  ;;  %847 = vmatpush.msrb.mxu1 %v449_v39  ;;  %v463_v37 = vld [vmem:[#allocation2 + $0x940] sm:$0xff]  ;;  %v260_v38 = vld [vmem:[#allocation2 + $0x2e8] sm:$0xff] }
  0xa1   :  { %868 = vmatpush.msrb.mxu2 %v246_v40  ;;  %887 = vmatpush.msrb.mxu3 %v450_v41  ;;  %v464_v39 = vld [vmem:[#allocation2 + $0x948] sm:$0xff]  ;;  %v247_v40 = vld [vmem:[#allocation2 + $0x280] sm:$0xff] }
  0xa2   :  { %829 = vmatpush.msrb.mxu0 %v233_v42  ;;  %848 = vmatpush.msrb.mxu1 %v437_v43  ;;  %v451_v41 = vld [vmem:[#allocation2 + $0x8e0] sm:$0xff]  ;;  %v248_v42 = vld [vmem:[#allocation2 + $0x288] sm:$0xff] }
  0xa3   :  { %869 = vmatpush.msrb.mxu2 %v234_v44  ;;  %888 = vmatpush.msrb.mxu3 %v438_v45  ;;  %v452_v43 = vld [vmem:[#allocation2 + $0x8e8] sm:$0xff]  ;;  %v235_v44 = vld [vmem:[#allocation2 + $0x220] sm:$0xff] }
  0xa4   :  { %830 = vmatpush.msrb.mxu0 %v221_v46  ;;  %849 = vmatpush.msrb.mxu1 %v425_v47  ;;  %v439_v45 = vld [vmem:[#allocation2 + $0x880] sm:$0xff]  ;;  %v236_v46 = vld [vmem:[#allocation2 + $0x228] sm:$0xff] }
  0xa5   :  { %870 = vmatpush.msrb.mxu2 %v222_v48  ;;  %889 = vmatpush.msrb.mxu3 %v426_v49  ;;  %v440_v47 = vld [vmem:[#allocation2 + $0x888] sm:$0xff]  ;;  %v223_v48 = vld [vmem:[#allocation2 + $0x1c0] sm:$0xff] }
  0xa6   :  { %831 = vmatpush.msrb.mxu0 %v209_v50  ;;  %850 = vmatpush.msrb.mxu1 %v413_v51  ;;  %v427_v49 = vld [vmem:[#allocation2 + $0x820] sm:$0xff]  ;;  %v224_v50 = vld [vmem:[#allocation2 + $0x1c8] sm:$0xff] }
  0xa7   :  { %871 = vmatpush.msrb.mxu2 %v210_v52  ;;  %890 = vmatpush.msrb.mxu3 %v414_v53  ;;  %v428_v51 = vld [vmem:[#allocation2 + $0x828] sm:$0xff]  ;;  %v211_v52 = vld [vmem:[#allocation2 + $0x160] sm:$0xff] }
  0xa8   :  { %832 = vmatpush.msrb.mxu0 %v197_v55  ;;  %851 = vmatpush.msrb.mxu1 %v401_v56  ;;  %v415_v53 = vld [vmem:[#allocation2 + $0x7c0] sm:$0xff]  ;;  %v212_v55 = vld [vmem:[#allocation2 + $0x168] sm:$0xff] }
  0xa9   :  { %872 = vmatpush.msrb.mxu2 %v198_v57  ;;  %891 = vmatpush.msrb.mxu3 %v402_v58  ;;  %v416_v56 = vld [vmem:[#allocation2 + $0x7c8] sm:$0xff]  ;;  %v199_v57 = vld [vmem:[#allocation2 + $0x100] sm:$0xff] }
  0xaa   :  { %833 = vmatpush.msrb.mxu0 %v185_v60  ;;  %852 = vmatpush.msrb.mxu1 %v389_v61  ;;  %v403_v58 = vld [vmem:[#allocation2 + $0x760] sm:$0xff]  ;;  %v200_v60 = vld [vmem:[#allocation2 + $0x108] sm:$0xff] }
  0xab   :  { %873 = vmatpush.msrb.mxu2 %v186_v62  ;;  %892 = vmatpush.msrb.mxu3 %v390_v63  ;;  %v404_v61 = vld [vmem:[#allocation2 + $0x768] sm:$0xff]  ;;  %v187_v62 = vld [vmem:[#allocation2 + $0xa0] sm:$0xff] }
  0xac   :  { %834 = vmatpush.msrb.mxu0 %v173_v0  ;;  %853 = vmatpush.msrb.mxu1 %v377_v1  ;;  %v391_v63 = vld [vmem:[#allocation2 + $0x700] sm:$0xff]  ;;  %v188_v0 = vld [vmem:[#allocation2 + $0xa8] sm:$0xff] }
  0xad   :  { %874 = vmatpush.msrb.mxu2 %v174_v2  ;;  %893 = vmatpush.msrb.mxu3 %v378_v3  ;;  %v392_v1 = vld [vmem:[#allocation2 + $0x708] sm:$0xff]  ;;  %v175_v2 = vld [vmem:[#allocation2 + $0x40] sm:$0xff] }
  0xae   :  { %899 = vmatpush.msra.mxu0 %v355_v4  ;;  %854 = vmatpush.msrb.mxu1 %v365_v6  ;;  %v379_v3 = vld [vmem:[#allocation2 + $0x6a0] sm:$0xff]  ;;  %v176_v4 = vld [vmem:[#allocation2 + $0x48] sm:$0xff]  ;;  %v357_v6 = vld [vmem:[#allocation2 + $0x5f0] sm:$0xff] }
  0xaf   :  { %939 = vmatpush.msra.mxu2 %v356_v5  ;;  %894 = vmatpush.msrb.mxu3 %v366_v7  ;;  %v380_v5 = vld [vmem:[#allocation2 + $0x6a8] sm:$0xff]  ;;  %v358_v7 = vld [vmem:[#allocation2 + $0x5f8] sm:$0xff] }
  0xb0   :  { %900 = vmatpush.msra.mxu0 %v343_v8  ;;  %919 = vmatpush.msra.mxu1 %v547_v9  ;;  %v367_v8 = vld [vmem:[#allocation2 + $0x640] sm:$0xff]  ;;  %v368_v9 = vld [vmem:[#allocation2 + $0x648] sm:$0xff] }
  0xb1   :  { %940 = vmatpush.msra.mxu2 %v344_v10  ;;  %959 = vmatpush.msra.mxu3 %v548_v11  ;;  %v345_v10 = vld [vmem:[#allocation2 + $0x590] sm:$0xff] }
  0xb2   :  { %901 = vmatpush.msra.mxu0 %v331_v12  ;;  %920 = vmatpush.msra.mxu1 %v535_v13  ;;  %v549_v11 = vld [vmem:[#allocation2 + $0xbf0] sm:$0xff]  ;;  %v346_v12 = vld [vmem:[#allocation2 + $0x598] sm:$0xff] }
  0xb3   :  { %941 = vmatpush.msra.mxu2 %v332_v14  ;;  %960 = vmatpush.msra.mxu3 %v536_v15  ;;  %v550_v13 = vld [vmem:[#allocation2 + $0xbf8] sm:$0xff]  ;;  %v333_v14 = vld [vmem:[#allocation2 + $0x530] sm:$0xff] }
  0xb4   :  { %902 = vmatpush.msra.mxu0 %v319_v16  ;;  %921 = vmatpush.msra.mxu1 %v523_v17  ;;  %v537_v15 = vld [vmem:[#allocation2 + $0xb90] sm:$0xff]  ;;  %v334_v16 = vld [vmem:[#allocation2 + $0x538] sm:$0xff] }
  0xb5   :  { %942 = vmatpush.msra.mxu2 %v320_v18  ;;  %961 = vmatpush.msra.mxu3 %v524_v19  ;;  %v538_v17 = vld [vmem:[#allocation2 + $0xb98] sm:$0xff]  ;;  %v525_v18 = vld [vmem:[#allocation2 + $0xb30] sm:$0xff] }
  0xb6   :  { %903 = vmatpush.msra.mxu0 %v307_v20  ;;  %922 = vmatpush.msra.mxu1 %v511_v21  ;;  %v322_v19 = vld [vmem:[#allocation2 + $0x4d8] sm:$0xff]  ;;  %v309_v21 = vld [vmem:[#allocation2 + $0x470] sm:$0xff] }
  0xb7   :  { %943 = vmatpush.msra.mxu2 %v308_v22  ;;  %962 = vmatpush.msra.mxu3 %v512_v23  ;;  %v526_v20 = vld [vmem:[#allocation2 + $0xb38] sm:$0xff]  ;;  %v513_v22 = vld [vmem:[#allocation2 + $0xad0] sm:$0xff] }
  0xb8   :  { %904 = vmatpush.msra.mxu0 %v295_v24  ;;  %923 = vmatpush.msra.mxu1 %v499_v25  ;;  %v514_v23 = vld [vmem:[#allocation2 + $0xad8] sm:$0xff]  ;;  %v297_v24 = vld [vmem:[#allocation2 + $0x410] sm:$0xff] }
  0xb9   :  { %944 = vmatpush.msra.mxu2 %v296_v26  ;;  %963 = vmatpush.msra.mxu3 %v500_v27  ;;  %v501_v25 = vld [vmem:[#allocation2 + $0xa70] sm:$0xff]  ;;  %v298_v26 = vld [vmem:[#allocation2 + $0x418] sm:$0xff] }
  0xba   :  { %905 = vmatpush.msra.mxu0 %v283_v28  ;;  %924 = vmatpush.msra.mxu1 %v487_v29  ;;  %v502_v27 = vld [vmem:[#allocation2 + $0xa78] sm:$0xff]  ;;  %v285_v28 = vld [vmem:[#allocation2 + $0x3b0] sm:$0xff] }
  0xbb   :  { %945 = vmatpush.msra.mxu2 %v284_v30  ;;  %964 = vmatpush.msra.mxu3 %v488_v31  ;;  %v489_v29 = vld [vmem:[#allocation2 + $0xa10] sm:$0xff]  ;;  %v286_v30 = vld [vmem:[#allocation2 + $0x3b8] sm:$0xff] }
  0xbc   :  { %906 = vmatpush.msra.mxu0 %v271_v32  ;;  %925 = vmatpush.msra.mxu1 %v475_v33  ;;  %v490_v31 = vld [vmem:[#allocation2 + $0xa18] sm:$0xff]  ;;  %v273_v32 = vld [vmem:[#allocation2 + $0x350] sm:$0xff] }
  0xbd   :  { %946 = vmatpush.msra.mxu2 %v272_v34  ;;  %965 = vmatpush.msra.mxu3 %v476_v35  ;;  %v477_v33 = vld [vmem:[#allocation2 + $0x9b0] sm:$0xff]  ;;  %v274_v34 = vld [vmem:[#allocation2 + $0x358] sm:$0xff] }
  0xbe   :  { %907 = vmatpush.msra.mxu0 %v259_v36  ;;  %926 = vmatpush.msra.mxu1 %v463_v37  ;;  %v478_v35 = vld [vmem:[#allocation2 + $0x9b8] sm:$0xff]  ;;  %v261_v36 = vld [vmem:[#allocation2 + $0x2f0] sm:$0xff] }
  0xbf   :  { %947 = vmatpush.msra.mxu2 %v260_v38  ;;  %966 = vmatpush.msra.mxu3 %v464_v39  ;;  %v465_v37 = vld [vmem:[#allocation2 + $0x950] sm:$0xff]  ;;  %v262_v38 = vld [vmem:[#allocation2 + $0x2f8] sm:$0xff] }
  0xc0   :  { %908 = vmatpush.msra.mxu0 %v247_v40  ;;  %927 = vmatpush.msra.mxu1 %v451_v41  ;;  %v466_v39 = vld [vmem:[#allocation2 + $0x958] sm:$0xff]  ;;  %v249_v40 = vld [vmem:[#allocation2 + $0x290] sm:$0xff] }
  0xc1   :  { %948 = vmatpush.msra.mxu2 %v248_v42  ;;  %967 = vmatpush.msra.mxu3 %v452_v43  ;;  %v453_v41 = vld [vmem:[#allocation2 + $0x8f0] sm:$0xff]  ;;  %v250_v42 = vld [vmem:[#allocation2 + $0x298] sm:$0xff] }
  0xc2   :  { %909 = vmatpush.msra.mxu0 %v235_v44  ;;  %928 = vmatpush.msra.mxu1 %v439_v45  ;;  %v454_v43 = vld [vmem:[#allocation2 + $0x8f8] sm:$0xff]  ;;  %v237_v44 = vld [vmem:[#allocation2 + $0x230] sm:$0xff] }
  0xc3   :  { %949 = vmatpush.msra.mxu2 %v236_v46  ;;  %968 = vmatpush.msra.mxu3 %v440_v47  ;;  %v441_v45 = vld [vmem:[#allocation2 + $0x890] sm:$0xff]  ;;  %v238_v46 = vld [vmem:[#allocation2 + $0x238] sm:$0xff] }
  0xc4   :  { %910 = vmatpush.msra.mxu0 %v223_v48  ;;  %929 = vmatpush.msra.mxu1 %v427_v49  ;;  %v442_v47 = vld [vmem:[#allocation2 + $0x898] sm:$0xff]  ;;  %v225_v48 = vld [vmem:[#allocation2 + $0x1d0] sm:$0xff] }
  0xc5   :  { %950 = vmatpush.msra.mxu2 %v224_v50  ;;  %969 = vmatpush.msra.mxu3 %v428_v51  ;;  %v429_v49 = vld [vmem:[#allocation2 + $0x830] sm:$0xff]  ;;  %v226_v50 = vld [vmem:[#allocation2 + $0x1d8] sm:$0xff] }
  0xc6   :  { %875 = vmatmul.f32.vlgmr.msrb.gmra.mxu2 %v2005_v54  ;;  %911 = vmatpush.msra.mxu0 %v211_v52  ;;  %v430_v51 = vld [vmem:[#allocation2 + $0x838] sm:$0xff]  ;;  %v417_v52 = vld [vmem:[#allocation2 + $0x7d0] sm:$0xff] }
  0xc7   :  { %930 = vmatpush.msra.mxu1 %v415_v53  ;;  %951 = vmatpush.msra.mxu2 %v212_v55  ;;  %v213_v53 = vld [vmem:[#allocation2 + $0x170] sm:$0xff]  ;;  %v214_v55 = vld [vmem:[#allocation2 + $0x178] sm:$0xff] }
  0xc8   :  { %970 = vmatpush.msra.mxu3 %v416_v56  ;;  %912 = vmatpush.msra.mxu0 %v199_v57  ;;  %v418_v56 = vld [vmem:[#allocation2 + $0x7d8] sm:$0xff]  ;;  %v1677_v57 = vld [vmem:[%s2109_s0] sm:$0xff] }
  0xc9   :  { %895 = vmatmul.f32.vlgmr.msrb.gmra.mxu3 %v2010_v59  ;;  %931 = vmatpush.msra.mxu1 %v403_v58  ;;  %v201_v58 = vld [vmem:[#allocation2 + $0x110] sm:$0xff] }
  0xca   :  { %952 = vmatpush.msra.mxu2 %v200_v60  ;;  %971 = vmatpush.msra.mxu3 %v404_v61  ;;  %v405_v60 = vld [vmem:[#allocation2 + $0x770] sm:$0xff]  ;;  %v202_v61 = vld [vmem:[#allocation2 + $0x118] sm:$0xff] }
  0xcb   :  { %913 = vmatpush.msra.mxu0 %v187_v62  ;;  %932 = vmatpush.msra.mxu1 %v391_v63  ;;  %v406_v62 = vld [vmem:[#allocation2 + $0x778] sm:$0xff]  ;;  %v1678_v63 = vld [vmem:[%s2109_s0 + $0x8] sm:$0xff] }
  0xcc   :  { %953 = vmatpush.msra.mxu2 %v188_v0  ;;  %972 = vmatpush.msra.mxu3 %v392_v1  ;;  %v189_v0 = vld [vmem:[#allocation2 + $0xb0] sm:$0xff] }
  0xcd   :  { %914 = vmatpush.msra.mxu0 %v175_v2  ;;  %933 = vmatpush.msra.mxu1 %v379_v3  ;;  %v393_v1 = vld [vmem:[#allocation2 + $0x710] sm:$0xff]  ;;  %v190_v2 = vld [vmem:[#allocation2 + $0xb8] sm:$0xff] }
  0xce   :  { %954 = vmatpush.msra.mxu2 %v176_v4  ;;  %973 = vmatpush.msra.mxu3 %v380_v5  ;;  %v394_v3 = vld [vmem:[#allocation2 + $0x718] sm:$0xff]  ;;  %v177_v4 = vld [vmem:[#allocation2 + $0x50] sm:$0xff] }
  0xcf   :  { %835 = vmatmul.f32.vlgmr.msrb.gmra.mxu0 %v2005_v54  ;;  %955 = vmatmul.f32.vlgmr.msra.gmra.mxu2 %v2005_v54  ;;  %v321_v54 = vld [vmem:[#allocation2 + $0x4d0] sm:$0xff] }
  0xd0   :  { %979 = vmatpush.msrb.mxu0 %v357_v6  ;;  %1019 = vmatpush.msrb.mxu2 %v358_v7  ;;  %v381_v5 = vld [vmem:[#allocation2 + $0x6b0] sm:$0xff]  ;;  %v178_v6 = vld [vmem:[#allocation2 + $0x58] sm:$0xff] }
  0xd1   :  { %934 = vmatpush.msra.mxu1 %v367_v8  ;;  %974 = vmatpush.msra.mxu3 %v368_v9  ;;  %v382_v7 = vld [vmem:[#allocation2 + $0x6b8] sm:$0xff]  ;;  %v369_v8 = vld [vmem:[#allocation2 + $0x650] sm:$0xff] }
  0xd2   :  { %855 = vmatmul.f32.vlgmr.msrb.gmra.mxu1 %v2010_v59  ;;  %975 = vmatmul.f32.vlgmr.msra.gmra.mxu3 %v2010_v59  ;;  %v310_v59 = vld [vmem:[#allocation2 + $0x478] sm:$0xff] }
  0xd3   :  { %980 = vmatpush.msrb.mxu0 %v345_v10  ;;  %999 = vmatpush.msrb.mxu1 %v549_v11  ;;  %v370_v9 = vld [vmem:[#allocation2 + $0x658] sm:$0xff]  ;;  %v1152_v10 = vld [vmem:[#allocation6 + $0x1e0] sm:$0xff] }
  0xd4   :  { %1020 = vmatpush.msrb.mxu2 %v346_v12  ;;  %1039 = vmatpush.msrb.mxu3 %v550_v13  ;;  %v1153_v11 = vld [vmem:[#allocation6 + $0x1e8] sm:$0xff]  ;;  %v1148_v12 = vld [vmem:[#allocation6 + $0x1c0] sm:$0xff] }
  0xd5   :  { %981 = vmatpush.msrb.mxu0 %v333_v14  ;;  %1000 = vmatpush.msrb.mxu1 %v537_v15  ;;  %v1149_v13 = vld [vmem:[#allocation6 + $0x1c8] sm:$0xff]  ;;  %v1144_v14 = vld [vmem:[#allocation6 + $0x1a0] sm:$0xff] }
  0xd6   :  { %1021 = vmatpush.msrb.mxu2 %v334_v16  ;;  %1040 = vmatpush.msrb.mxu3 %v538_v17  ;;  %v1145_v15 = vld [vmem:[#allocation6 + $0x1a8] sm:$0xff]  ;;  %v1140_v16 = vld [vmem:[#allocation6 + $0x180] sm:$0xff] }
  0xd7   :  { %982 = vmatpush.msrb.mxu0 %v321_v54  ;;  %1001 = vmatpush.msrb.mxu1 %v525_v18  ;;  %v1141_v17 = vld [vmem:[#allocation6 + $0x188] sm:$0xff]  ;;  %v1136_v54 = vld [vmem:[#allocation6 + $0x160] sm:$0xff] }
  0xd8   :  { %1022 = vmatpush.msrb.mxu2 %v322_v19  ;;  %1041 = vmatpush.msrb.mxu3 %v526_v20  ;;  %v1137_v18 = vld [vmem:[#allocation6 + $0x168] sm:$0xff]  ;;  %v1132_v19 = vld [vmem:[#allocation6 + $0x140] sm:$0xff] }
  0xd9   :  { %983 = vmatpush.msrb.mxu0 %v309_v21  ;;  %1002 = vmatpush.msrb.mxu1 %v513_v22  ;;  %v1133_v20 = vld [vmem:[#allocation6 + $0x148] sm:$0xff]  ;;  %v1216_v21 = vld [vmem:[#allocation6 + $0x3e0] sm:$0xff] }
  0xda   :  { %1023 = vmatpush.msrb.mxu2 %v310_v59  ;;  %1042 = vmatpush.msrb.mxu3 %v514_v23  ;;  %v1212_v22 = vld [vmem:[#allocation6 + $0x3c0] sm:$0xff]  ;;  %v1129_v23 = vld [vmem:[#allocation6 + $0x128] sm:$0xff] }
  0xdb   :  { %984 = vmatpush.msrb.mxu0 %v297_v24  ;;  %1003 = vmatpush.msrb.mxu1 %v501_v25  ;;  %v1128_v59 = vld [vmem:[#allocation6 + $0x120] sm:$0xff] }
  0xdc   :  { %1024 = vmatpush.msrb.mxu2 %v298_v26  ;;  %1043 = vmatpush.msrb.mxu3 %v502_v27  ;;  %v1208_v24 = vld [vmem:[#allocation6 + $0x3a0] sm:$0xff]  ;;  %v1125_v27 = vld [vmem:[#allocation6 + $0x108] sm:$0xff] }
  0xdd   :  { %985 = vmatpush.msrb.mxu0 %v285_v28  ;;  %1004 = vmatpush.msrb.mxu1 %v489_v29  ;;  %v1280_v25 = vld [vmem:[#allocation6 + $0x5e0] sm:$0xff] }
  0xde   :  { %1025 = vmatpush.msrb.mxu2 %v286_v30  ;;  %1044 = vmatpush.msrb.mxu3 %v490_v31  ;;  %v1124_v26 = vld [vmem:[#allocation6 + $0x100] sm:$0xff]  ;;  %v1121_v31 = vld [vmem:[#allocation6 + $0xe8] sm:$0xff] }
  0xdf   :  { %986 = vmatpush.msrb.mxu0 %v273_v32  ;;  %1005 = vmatpush.msrb.mxu1 %v477_v33  ;;  %v1276_v28 = vld [vmem:[#allocation6 + $0x5c0] sm:$0xff] }
  0xe0   :  { %1026 = vmatpush.msrb.mxu2 %v274_v34  ;;  %1045 = vmatpush.msrb.mxu3 %v478_v35  ;;  %v1204_v29 = vld [vmem:[#allocation6 + $0x380] sm:$0xff] }
  0xe1   :  { %987 = vmatpush.msrb.mxu0 %v261_v36  ;;  %1006 = vmatpush.msrb.mxu1 %v465_v37  ;;  %v1120_v30 = vld [vmem:[#allocation6 + $0xe0] sm:$0xff]  ;;  %v1117_v36 = vld [vmem:[#allocation6 + $0xc8] sm:$0xff] }
  0xe2   :  { %1027 = vmatpush.msrb.mxu2 %v262_v38  ;;  %1046 = vmatpush.msrb.mxu3 %v466_v39  ;;  %v1272_v32 = vld [vmem:[#allocation6 + $0x5a0] sm:$0xff] }
  0xe3   :  { %988 = vmatpush.msrb.mxu0 %v249_v40  ;;  %1007 = vmatpush.msrb.mxu1 %v453_v41  ;;  %v1200_v33 = vld [vmem:[#allocation6 + $0x360] sm:$0xff]  ;;  %v1113_v40 = vld [vmem:[#allocation6 + $0xa8] sm:$0xff] }
  0xe4   :  { %1028 = vmatpush.msrb.mxu2 %v250_v42  ;;  %1047 = vmatpush.msrb.mxu3 %v454_v43  ;;  %v1268_v34 = vld [vmem:[#allocation6 + $0x580] sm:$0xff]  ;;  %v1109_v43 = vld [vmem:[#allocation6 + $0x88] sm:$0xff] }
  0xe5   :  { %989 = vmatpush.msrb.mxu0 %v237_v44  ;;  %1008 = vmatpush.msrb.mxu1 %v441_v45  ;;  %v1116_v35 = vld [vmem:[#allocation6 + $0xc0] sm:$0xff] }
  0xe6   :  { %1029 = vmatpush.msrb.mxu2 %v238_v46  ;;  %1048 = vmatpush.msrb.mxu3 %v442_v47  ;;  %v1196_v37 = vld [vmem:[#allocation6 + $0x340] sm:$0xff]  ;;  %v1105_v46 = vld [vmem:[#allocation6 + $0x68] sm:$0xff] }
  0xe7   :  { %990 = vmatpush.msrb.mxu0 %v225_v48  ;;  %1009 = vmatpush.msrb.mxu1 %v429_v49  ;;  %v1264_v38 = vld [vmem:[#allocation6 + $0x560] sm:$0xff]  ;;  %v1101_v48 = vld [vmem:[#allocation6 + $0x48] sm:$0xff] }
  0xe8   :  { %1030 = vmatpush.msrb.mxu2 %v226_v50  ;;  %1049 = vmatpush.msrb.mxu3 %v430_v51  ;;  %v1112_v39 = vld [vmem:[#allocation6 + $0xa0] sm:$0xff]  ;;  %v1097_v50 = vld [vmem:[#allocation6 + $0x28] sm:$0xff] }
  0xe9   :  { %915 = vmatmul.f32.vlgmr.msra.gmra.mxu0 %v1677_v57  ;;  %1010 = vmatpush.msrb.mxu1 %v417_v52  ;;  %v1192_v41 = vld [vmem:[#allocation6 + $0x320] sm:$0xff]  ;;  %v1093_v52 = vld [vmem:[#allocation6 + $0x8] sm:$0xff] }
  0xea   :  { %991 = vmatpush.msrb.mxu0 %v213_v53  ;;  %1031 = vmatpush.msrb.mxu2 %v214_v55  ;;  %v1108_v42 = vld [vmem:[#allocation6 + $0x80] sm:$0xff]  ;;  %v1217_v53 = vld [vmem:[#allocation6 + $0x3e8] sm:$0xff]  ;;  %v1218_v55 = vld [vmem:[#allocation6 + $0x3f0] sm:$0xff] }
  0xeb   :  { %1050 = vmatpush.msrb.mxu3 %v418_v56  ;;  %935 = vmatmul.f32.vlgmr.msra.gmra.mxu1 %v1678_v63  ;;  %v1188_v44 = vld [vmem:[#allocation6 + $0x300] sm:$0xff]  ;;  %v1213_v56 = vld [vmem:[#allocation6 + $0x3c8] sm:$0xff] }
  0xec   :  { %992 = vmatpush.msrb.mxu0 %v201_v58  ;;  %1011 = vmatpush.msrb.mxu1 %v405_v60  ;;  %v1104_v45 = vld [vmem:[#allocation6 + $0x60] sm:$0xff]  ;;  %v1209_v58 = vld [vmem:[#allocation6 + $0x3a8] sm:$0xff]  ;;  %v1210_v60 = vld [vmem:[#allocation6 + $0x3b0] sm:$0xff] }
  0xed   :  { %1032 = vmatpush.msrb.mxu2 %v202_v61  ;;  %1051 = vmatpush.msrb.mxu3 %v406_v62  ;;  %v1100_v47 = vld [vmem:[#allocation6 + $0x40] sm:$0xff]  ;;  %v1205_v61 = vld [vmem:[#allocation6 + $0x388] sm:$0xff]  ;;  %v1206_v62 = vld [vmem:[#allocation6 + $0x390] sm:$0xff] }
  0xee   :  { %993 = vmatpush.msrb.mxu0 %v189_v0  ;;  %1012 = vmatpush.msrb.mxu1 %v393_v1  ;;  %v1096_v49 = vld [vmem:[#allocation6 + $0x20] sm:$0xff]  ;;  %v1201_v1 = vld [vmem:[#allocation6 + $0x368] sm:$0xff] }
  0xef   :  { %1033 = vmatpush.msrb.mxu2 %v190_v2  ;;  %1052 = vmatpush.msrb.mxu3 %v394_v3  ;;  %v1092_v51 = vld [vmem:[#allocation6] sm:$0xff]  ;;  %v1202_v2 = vld [vmem:[#allocation6 + $0x370] sm:$0xff]  ;;  %v2036_v3 = vpop.f32.mrf.mxu2 }
  0xf0   :  { %994 = vmatpush.msrb.mxu0 %v177_v4  ;;  %1013 = vmatpush.msrb.mxu1 %v381_v5  ;;  %v1260_v0 = vld [vmem:[#allocation6 + $0x540] sm:$0xff] }
  0xf1   :  { %1034 = vmatpush.msrb.mxu2 %v178_v6  ;;  %1053 = vmatpush.msrb.mxu3 %v382_v7  ;;  %v1180_v4 = vld [vmem:[#allocation6 + $0x2c0] sm:$0xff]  ;;  %v1197_v6 = vld [vmem:[#allocation6 + $0x348] sm:$0xff]  ;;  %v1198_v7 = vld [vmem:[#allocation6 + $0x350] sm:$0xff] }
  0xf2   :  { %995 = vmatmul.f32.vlgmr.msrb.gmra.mxu0 %v1677_v57  ;;  %1035 = vmatmul.f32.vlgmr.msrb.gmra.mxu2 %v1677_v57  ;;  %v1214_v57 = vld [vmem:[#allocation6 + $0x3d0] sm:$0xff]  ;;  %v1256_v5 = vld [vmem:[#allocation6 + $0x520] sm:$0xff] }
  0xf3   :  { %1014 = vmatpush.msrb.mxu1 %v369_v8  ;;  %1054 = vmatpush.msrb.mxu3 %v370_v9  ;;  %v1176_v8 = vld [vmem:[#allocation6 + $0x2a0] sm:$0xff] }
  0xf4   :  { %1015 = vmatmul.f32.vlgmr.msrb.gmra.mxu1 %v1678_v63  ;;  %1055 = vmatmul.f32.vlgmr.msrb.gmra.mxu3 %v1678_v63  ;;  %v1184_v63 = vld [vmem:[#allocation6 + $0x2e0] sm:$0xff] }
  0xf5   :  { %1294 = vmatpush.msra.mxu0 %v1152_v10  ;;  %1354 = vmatpush.msra.mxu3 %v1153_v11  ;;  %v1252_v9 = vld [vmem:[#allocation6 + $0x500] sm:$0xff]  ;;  %v1193_v10 = vld [vmem:[#allocation6 + $0x328] sm:$0xff]  ;;  %v2038_v11 = vpop.f32.mrf.mxu3 }
  0xf6   :  { %1314 = vmatpush.msra.mxu1 %v1216_v21  ;;  %1334 = vmatpush.msra.mxu2 %v1280_v25  ;;  %v1186_v21 = vld [vmem:[#allocation6 + $0x2f0] sm:$0xff] }
  0xf7   :  { %1295 = vmatpush.msra.mxu0 %v1148_v12  ;;  %1355 = vmatpush.msra.mxu3 %v1149_v13  ;;  %v2040_v12 = vpop.f32.mrf.mxu0  ;;  %v1194_v13 = vld [vmem:[#allocation6 + $0x330] sm:$0xff]  ;;  %v2044_v25 = vpop.f32.mrf.mxu2 }
  0xf8   :  { %1315 = vmatpush.msra.mxu1 %v1212_v22  ;;  %1335 = vmatpush.msra.mxu2 %v1276_v28  ;;  %v1164_v22 = vld [vmem:[#allocation6 + $0x240] sm:$0xff]  ;;  %v1177_v28 = vld [vmem:[#allocation6 + $0x2a8] sm:$0xff] }
  0xf9   :  { %1296 = vmatpush.msra.mxu0 %v1144_v14  ;;  %1356 = vmatpush.msra.mxu3 %v1145_v15  ;;  %v1172_v14 = vld [vmem:[#allocation6 + $0x280] sm:$0xff] }
  0xfa   :  { %1316 = vmatpush.msra.mxu1 %v1208_v24  ;;  %1336 = vmatpush.msra.mxu2 %v1272_v32  ;;  %v1248_v15 = vld [vmem:[#allocation6 + $0x4e0] sm:$0xff]  ;;  %v1182_v24 = vld [vmem:[#allocation6 + $0x2d0] sm:$0xff] }
  0xfb   :  { %1297 = vmatpush.msra.mxu0 %v1140_v16  ;;  %1357 = vmatpush.msra.mxu3 %v1141_v17  ;;  %v1189_v16 = vld [vmem:[#allocation6 + $0x308] sm:$0xff]  ;;  %v1190_v17 = vld [vmem:[#allocation6 + $0x310] sm:$0xff]  ;;  %v1232_v32 = vld [vmem:[#allocation6 + $0x460] sm:$0xff] }
  0xfc   :  { %1317 = vmatpush.msra.mxu1 %v1204_v29  ;;  %1337 = vmatpush.msra.mxu2 %v1268_v34 }
  0xfd   :  { %1298 = vmatpush.msra.mxu0 %v1136_v54  ;;  %1358 = vmatpush.msra.mxu3 %v1137_v18  ;;  %v1168_v54 = vld [vmem:[#allocation6 + $0x260] sm:$0xff]  ;;  %v2048_v34 = vpop.f32.mrf.mxu3 }
  0xfe   :  { %1318 = vmatpush.msra.mxu1 %v1200_v33  ;;  %1338 = vmatpush.msra.mxu2 %v1264_v38  ;;  %v1244_v18 = vld [vmem:[#allocation6 + $0x4c0] sm:$0xff]  ;;  %v1173_v33 = vld [vmem:[#allocation6 + $0x288] sm:$0xff] }
  0xff   :  { %1299 = vmatpush.msra.mxu0 %v1132_v19  ;;  %1359 = vmatpush.msra.mxu3 %v1133_v20  ;;  %v1185_v19 = vld [vmem:[#allocation6 + $0x2e8] sm:$0xff]  ;;  %v2042_v20 = vpop.f32.mrf.mxu1  ;;  %v1228_v38 = vld [vmem:[#allocation6 + $0x440] sm:$0xff] }
 0x100   :  { %1319 = vmatpush.msra.mxu1 %v1196_v37  ;;  %1339 = vmatpush.msra.mxu2 %v1260_v0  ;;  %v2046_v29 = vpop.f32.mrf.mxu0 }
 0x101   :  { %1300 = vmatpush.msra.mxu0 %v1128_v59  ;;  %1360 = vmatpush.msra.mxu3 %v1129_v23  ;;  %v1240_v59 = vld [vmem:[#allocation6 + $0x4a0] sm:$0xff]  ;;  %v1181_v23 = vld [vmem:[#allocation6 + $0x2c8] sm:$0xff] }
 0x102   :  { %1320 = vmatpush.msra.mxu1 %v1192_v41  ;;  %1340 = vmatpush.msra.mxu2 %v1256_v5  ;;  %v1277_v41 = vld [vmem:[#allocation6 + $0x5c8] sm:$0xff] }
 0x103   :  { %1301 = vmatpush.msra.mxu0 %v1124_v26  ;;  %1361 = vmatpush.msra.mxu3 %v1125_v27  ;;  %v1160_v26 = vld [vmem:[#allocation6 + $0x220] sm:$0xff] }
 0x104   :  { %1321 = vmatpush.msra.mxu1 %v1188_v44  ;;  %1341 = vmatpush.msra.mxu2 %v1252_v9  ;;  %v1236_v27 = vld [vmem:[#allocation6 + $0x480] sm:$0xff]  ;;  %v1166_v44 = vld [vmem:[#allocation6 + $0x250] sm:$0xff] }
 0x105   :  { %1302 = vmatpush.msra.mxu0 %v1120_v30  ;;  %1362 = vmatpush.msra.mxu3 %v1121_v31  ;;  %v1178_v30 = vld [vmem:[#allocation6 + $0x2b0] sm:$0xff]  ;;  %v1156_v31 = vld [vmem:[#allocation6 + $0x200] sm:$0xff] }
 0x106   :  { %1322 = vmatpush.msra.mxu1 %v1184_v63  ;;  %1342 = vmatpush.msra.mxu2 %v1248_v15  ;;  %v2071_v15 = vld [vmem:[#allocation4 + $0x8] sm:$0xf] }
 0x107   :  { %1303 = vmatpush.msra.mxu0 %v1116_v35  ;;  %1363 = vmatpush.msra.mxu3 %v1117_v36  ;;  %v1174_v35 = vld [vmem:[#allocation6 + $0x290] sm:$0xff]  ;;  %v1281_v36 = vld [vmem:[#allocation6 + $0x5e8] sm:$0xff]  ;;  %v2050_v37 = vpop.f32.mrf.mxu1 }
 0x108   :  { %1323 = vmatpush.msra.mxu1 %v1180_v4  ;;  %1343 = vmatpush.msra.mxu2 %v1244_v18  ;;  %v1142_v4 = vld [vmem:[#allocation6 + $0x190] sm:$0xff]  ;;  %v1245_v18 = vld [vmem:[#allocation6 + $0x4c8] sm:$0xff] }
 0x109   :  { %1304 = vmatpush.msra.mxu0 %v1112_v39  ;;  %1364 = vmatpush.msra.mxu3 %v1113_v40  ;;  %v1169_v39 = vld [vmem:[#allocation6 + $0x268] sm:$0xff]  ;;  %v1170_v40 = vld [vmem:[#allocation6 + $0x270] sm:$0xff] }
 0x10a   :  { %1324 = vmatpush.msra.mxu1 %v1176_v8  ;;  %1344 = vmatpush.msra.mxu2 %v1240_v59  ;;  %v1138_v8 = vld [vmem:[#allocation6 + $0x170] sm:$0xff] }
 0x10b   :  { %1305 = vmatpush.msra.mxu0 %v1108_v42  ;;  %1365 = vmatpush.msra.mxu3 %v1109_v43  ;;  %v1224_v42 = vld [vmem:[#allocation6 + $0x420] sm:$0xff]  ;;  %v1165_v43 = vld [vmem:[#allocation6 + $0x248] sm:$0xff] }
 0x10c   :  { %1325 = vmatpush.msra.mxu1 %v1172_v14  ;;  %1345 = vmatpush.msra.mxu2 %v1236_v27  ;;  %v1237_v27 = vld [vmem:[#allocation6 + $0x488] sm:$0xff] }
 0x10d   :  { %1306 = vmatpush.msra.mxu0 %v1104_v45  ;;  %1366 = vmatpush.msra.mxu3 %v1105_v46  ;;  %v1273_v45 = vld [vmem:[#allocation6 + $0x5a8] sm:$0xff]  ;;  %v1220_v46 = vld [vmem:[#allocation6 + $0x400] sm:$0xff] }
 0x10e   :  { %1326 = vmatpush.msra.mxu1 %v1168_v54  ;;  %1346 = vmatpush.msra.mxu2 %v1232_v32 }
 0x10f   :  { %1307 = vmatpush.msra.mxu0 %v1100_v47  ;;  %1367 = vmatpush.msra.mxu3 %v1101_v48  ;;  %v1161_v47 = vld [vmem:[#allocation6 + $0x228] sm:$0xff]  ;;  %v1162_v48 = vld [vmem:[#allocation6 + $0x230] sm:$0xff]  ;;  %v2060_v63 = vpop.f32.mrf.mxu1 }
 0x110   :  { %1327 = vmatpush.msra.mxu1 %v1164_v22  ;;  %1347 = vmatpush.msra.mxu2 %v1228_v38  ;;  %v1229_v38 = vld [vmem:[#allocation6 + $0x448] sm:$0xff] }
 0x111   :  { %1308 = vmatpush.msra.mxu0 %v1096_v49  ;;  %1368 = vmatpush.msra.mxu3 %v1097_v50  ;;  %v1269_v50 = vld [vmem:[#allocation6 + $0x588] sm:$0xff] }
 0x112   :  { %1328 = vmatpush.msra.mxu1 %v1160_v26  ;;  %1348 = vmatpush.msra.mxu2 %v1224_v42 }
 0x113   :  { %1309 = vmatpush.msra.mxu0 %v1092_v51  ;;  %1369 = vmatpush.msra.mxu3 %v1093_v52  ;;  %v1154_v51 = vld [vmem:[#allocation6 + $0x1f0] sm:$0xff]  ;;  %v1157_v52 = vld [vmem:[#allocation6 + $0x208] sm:$0xff] }
 0x114   :  { %1329 = vmatpush.msra.mxu1 %v1156_v31  ;;  %v2052_v49 = vpop.f32.mrf.mxu2  ;;  %1349 = vmatpush.msra.mxu2 %v1220_v46 }
 0x115   :  { %1374 = vmatpush.msrb.mxu0 %v1217_v53  ;;  %1434 = vmatpush.msrb.mxu3 %v1218_v55  ;;  %v1158_v53 = vld [vmem:[#allocation6 + $0x210] sm:$0xff]  ;;  %v1265_v55 = vld [vmem:[#allocation6 + $0x568] sm:$0xff] }
 0x116   :  { %1394 = vmatpush.msrb.mxu1 %v1281_v36  ;;  %1414 = vmatpush.msrb.mxu2 %v1154_v51 }
 0x117   :  { %1375 = vmatpush.msrb.mxu0 %v1213_v56  ;;  %1435 = vmatpush.msrb.mxu3 %v1214_v57  ;;  %v1150_v56 = vld [vmem:[#allocation6 + $0x1d0] sm:$0xff]  ;;  %v2054_v57 = vpop.f32.mrf.mxu0 }
 0x118   :  { %1395 = vmatpush.msrb.mxu1 %v1277_v41  ;;  %1415 = vmatpush.msrb.mxu2 %v1150_v56  ;;  %v1283_v56 = vld [vmem:[#allocation6 + $0x5f8] sm:$0xff] }
 0x119   :  { %1376 = vmatpush.msrb.mxu0 %v1209_v58  ;;  %1436 = vmatpush.msrb.mxu3 %v1210_v60  ;;  %v2056_v58 = vpop.f32.mrf.mxu3  ;;  %v1261_v60 = vld [vmem:[#allocation6 + $0x548] sm:$0xff] }
 0x11a   :  { %1396 = vmatpush.msrb.mxu1 %v1273_v45  ;;  %v1110_v45 = vld [vmem:[#allocation6 + $0x90] sm:$0xff] }
 0x11b   :  { %1377 = vmatpush.msrb.mxu0 %v1205_v61  ;;  %1437 = vmatpush.msrb.mxu3 %v1206_v62  ;;  %v1146_v61 = vld [vmem:[#allocation6 + $0x1b0] sm:$0xff] }
 0x11c   :  { %1397 = vmatpush.msrb.mxu1 %v1269_v50  ;;  %v2058_v62 = vld [vmem:[#allocation4] sm:$0xff]  ;;  %1416 = vmatpush.msrb.mxu2 %v1146_v61 }
 0x11d   :  { %1378 = vmatpush.msrb.mxu0 %v1201_v1  ;;  %1438 = vmatpush.msrb.mxu3 %v1202_v2  ;;  %v555_v0 = vperm.slane %v2058_v62, 0  ;;  %v558_v1 = vperm.slane %v2058_v62, 3  ;;  %v1257_v2 = vld [vmem:[#allocation6 + $0x528] sm:$0xff]  ;;  %v1278_v61 = vld [vmem:[#allocation6 + $0x5d0] sm:$0xff] }
 0x11e   :  { %1398 = vmatpush.msrb.mxu1 %v1265_v55  ;;  %1417 = vmatpush.msrb.mxu2 %v1142_v4  ;;  %v1282_v55 = vld [vmem:[#allocation6 + $0x5f0] sm:$0xff]  ;;  %v1275_v4 = vld [vmem:[#allocation6 + $0x5b8] sm:$0xff] }
 0x11f   :  { %1379 = vmatpush.msrb.mxu0 %v1197_v6  ;;  %1439 = vmatpush.msrb.mxu3 %v1198_v7  ;;  %v561_v6 = vperm.slane %v2058_v62, 6  ;;  %v1253_v7 = vld [vmem:[#allocation6 + $0x508] sm:$0xff]  ;;  %v597_v9 = vadd.f32 %v2040_v12, %v555_v0  ;;  %v1279_v0 = vld [vmem:[#allocation6 + $0x5d8] sm:$0xff] }
 0x120   :  { %1399 = vmatpush.msrb.mxu1 %v1261_v60  ;;  %1418 = vmatpush.msrb.mxu2 %v1138_v8  ;;  %v1098_v60 = vld [vmem:[#allocation6 + $0x30] sm:$0xff]  ;;  %v1271_v8 = vld [vmem:[#allocation6 + $0x598] sm:$0xff] }
 0x121   :  { %1380 = vmatpush.msrb.mxu0 %v1193_v10  ;;  %1440 = vmatpush.msrb.mxu3 %v1194_v13  ;;  %v717_v10 = vadd.f32 %v2044_v25, %v558_v1  ;;  %v617_v12 = vadd.f32 %v2042_v20, %v597_v9  ;;  %v1126_v25 = vld [vmem:[#allocation6 + $0x110] sm:$0xff]  ;;  %v556_v9 = vperm.slane %v2058_v62, 1 }
 0x122   :  { %1400 = vmatpush.msrb.mxu1 %v1257_v2  ;;  %v1118_v20 = vld [vmem:[#allocation6 + $0xd0] sm:$0xff] }
 0x123   :  { %1381 = vmatpush.msrb.mxu0 %v1189_v16  ;;  %1441 = vmatpush.msrb.mxu3 %v1190_v17  ;;  %v1249_v16 = vld [vmem:[#allocation6 + $0x4e8] sm:$0xff]  ;;  %v1134_v17 = vld [vmem:[#allocation6 + $0x150] sm:$0xff]  ;;  %v737_v59 = vadd.f32 %v2048_v34, %v717_v10  ;;  %v1059_v31 = vmax.f32 %v617_v12, 0.0  ;;  %v562_v10 = vperm.slane %v2058_v62, 7  ;;  %v557_v12 = vperm.slane %v2058_v62, 2 }
 0x124   :  { %1401 = vmatpush.msrb.mxu1 %v1253_v7  ;;  %1419 = vmatpush.msrb.mxu2 %v1134_v17  ;;  %v1094_v1 = vld [vmem:[#allocation6 + $0x10] sm:$0xff]  ;;  %v1267_v17 = vld [vmem:[#allocation6 + $0x578] sm:$0xff] }
 0x125   :  { %1382 = vmatpush.msrb.mxu0 %v1185_v19  ;;  %1442 = vmatpush.msrb.mxu3 %v1186_v21  ;;  %v1130_v19 = vld [vmem:[#allocation6 + $0x130] sm:$0xff]  ;;  %v564_v21 = vperm.slane %v2071_v15, 1  ;;  %v1062_v32 = vmax.f32 %v737_v59, 0.0  ;;  %v560_v59 = vperm.slane %v2058_v62, 5 }
 0x126   :  { %1402 = vmatpush.msrb.mxu1 %v1249_v16  ;;  %1420 = vmatpush.msrb.mxu2 %v1130_v19  ;;  %v1274_v2 = vld [vmem:[#allocation6 + $0x5b0] sm:$0xff] }
 0x127   :  { %1383 = vmatpush.msrb.mxu0 %v1181_v23  ;;  %1443 = vmatpush.msrb.mxu3 %v1182_v24  ;;  %v1241_v24 = vld [vmem:[#allocation6 + $0x4a8] sm:$0xff]  ;;  %v1074_v41 = vmin.f32 %v1062_v32, 6.0  ;;  %v1270_v7 = vld [vmem:[#allocation6 + $0x590] sm:$0xff] }
 0x128   :  { %1403 = vmatpush.msrb.mxu1 %v1245_v18  ;;  %1421 = vmatpush.msrb.mxu2 %v1126_v25  ;;  %v1266_v16 = vld [vmem:[#allocation6 + $0x570] sm:$0xff]  ;;  %v1259_v25 = vld [vmem:[#allocation6 + $0x538] sm:$0xff] }
 0x129   :  { %1384 = vmatpush.msrb.mxu0 %v1177_v28  ;;  %1444 = vmatpush.msrb.mxu3 %v1178_v30  ;;  %v1122_v28 = vld [vmem:[#allocation6 + $0xf0] sm:$0xff] }
 0x12a   :  { %1404 = vmatpush.msrb.mxu1 %v1241_v24  ;;  %1422 = vmatpush.msrb.mxu2 %v1122_v28  ;;  %v1262_v19 = vld [vmem:[#allocation6 + $0x550] sm:$0xff] }
 0x12b   :  { %1385 = vmatpush.msrb.mxu0 %v1173_v33  ;;  %1445 = vmatpush.msrb.mxu3 %v1174_v35  ;;  %v1233_v35 = vld [vmem:[#allocation6 + $0x468] sm:$0xff]  ;;  %v1258_v24 = vld [vmem:[#allocation6 + $0x530] sm:$0xff] }
 0x12c   :  { %1405 = vmatpush.msrb.mxu1 %v1237_v27  ;;  %1423 = vmatpush.msrb.mxu2 %v1118_v20  ;;  %v565_v27 = vperm.slane %v2071_v15, 2  ;;  %v1254_v28 = vld [vmem:[#allocation6 + $0x510] sm:$0xff] }
 0x12d   :  { %1386 = vmatpush.msrb.mxu0 %v1169_v39  ;;  %1446 = vmatpush.msrb.mxu3 %v1170_v40  ;;  %v1114_v39 = vld [vmem:[#allocation6 + $0xb0] sm:$0xff]  ;;  %v1071_v40 = vmin.f32 %v1059_v31, 6.0  ;;  %v677_v31 = vadd.f32 %v2046_v29, %v557_v12  ;;  %v1223_v12 = vld [vmem:[#allocation6 + $0x418] sm:$0xff] }
 0x12e   :  { %1406 = vmatpush.msrb.mxu1 %v1233_v35  ;;  %1424 = vmatpush.msrb.mxu2 %v1114_v39  ;;  %v1250_v32 = vld [vmem:[#allocation6 + $0x4f0] sm:$0xff] }
 0x12f   :  { %1387 = vmatpush.msrb.mxu0 %v1165_v43  ;;  %1447 = vmatpush.msrb.mxu3 %v1166_v44  ;;  %v1225_v44 = vld [vmem:[#allocation6 + $0x428] sm:$0xff]  ;;  %v1083_v50 = vmax.f32 %v1071_v40, %v1074_v41  ;;  %v566_v41 = vperm.slane %v2071_v15, 3 }
 0x130   :  { %1407 = vmatpush.msrb.mxu1 %v1229_v38  ;;  %1425 = vmatpush.msrb.mxu2 %v1110_v45  ;;  %v1247_v38 = vld [vmem:[#allocation6 + $0x4d8] sm:$0xff] }
 0x131   :  { %1388 = vmatpush.msrb.mxu0 %v1161_v47  ;;  %1448 = vmatpush.msrb.mxu3 %v1162_v48  ;;  %v1221_v47 = vld [vmem:[#allocation6 + $0x408] sm:$0xff]  ;;  %v1106_v48 = vld [vmem:[#allocation6 + $0x70] sm:$0xff] }
 0x132   :  { %1408 = vmatpush.msrb.mxu1 %v1225_v44  ;;  %1426 = vmatpush.msrb.mxu2 %v1106_v48  ;;  %v1239_v48 = vld [vmem:[#allocation6 + $0x498] sm:$0xff] }
 0x133   :  { %1389 = vmatpush.msrb.mxu0 %v1157_v52  ;;  %1449 = vmatpush.msrb.mxu3 %v1158_v53  ;;  %v1102_v52 = vld [vmem:[#allocation6 + $0x50] sm:$0xff] }
 0x134   :  { %1409 = vmatpush.msrb.mxu1 %v1221_v47  ;;  %1427 = vmatpush.msrb.mxu2 %v1102_v52  ;;  %v1238_v47 = vld [vmem:[#allocation6 + $0x490] sm:$0xff] }
 0x136   :  { %1428 = vmatpush.msrb.mxu2 %v1098_v60  ;;  %v1234_v60 = vld [vmem:[#allocation6 + $0x470] sm:$0xff] }
 0x138   :  { %1429 = vmatpush.msrb.mxu2 %v1094_v1 }
 0x149   :  { %v2064_v5 = vpop.f32.mrf.mxu2 }
 0x14c   :  { %v2069_v13 = vpop.f32.mrf.mxu3  ;;  %v836_v14 = vpop.f32.mrf.mxu0 }
 0x14d   :  { %v837_v54 = vadd.f32 %v836_v14, %v561_v6  ;;  %v559_v6 = vperm.slane %v2058_v62, 4  ;;  %v797_v62 = vadd.f32 %v2052_v49, %v560_v59 }
 0x14f   :  { %v856_v22 = vpop.f32.mrf.mxu1  ;;  %v817_v49 = vadd.f32 %v2056_v58, %v797_v62  ;;  %v1207_v62 = vld [vmem:[#allocation6 + $0x398] sm:$0xff] }
 0x150   :  { %v857_v23 = vadd.f32 %v856_v22, %v837_v54  ;;  %v757_v54 = vadd.f32 %v2054_v57, %v559_v6  ;;  %v637_v22 = vadd.f32 %v2036_v3, %v556_v9  ;;  %v563_v57 = vperm.slane %v2071_v15, 0  ;;  %v1255_v3 = vld [vmem:[#allocation6 + $0x518] sm:$0xff]  ;;  %v1230_v6 = vld [vmem:[#allocation6 + $0x450] sm:$0xff] }
 0x151   :  { %v1064_v52 = vmax.f32 %v817_v49, 0.0  ;;  %v1235_v15 = vld [vmem:[#allocation6 + $0x478] sm:$0xff] }
 0x152   :  { %v956_v26 = vpop.f32.mrf.mxu2  ;;  %v1065_v33 = vmax.f32 %v857_v23, 0.0  ;;  %v877_v23 = vadd.f32 %v2064_v5, %v562_v10  ;;  %v1103_v49 = vld [vmem:[#allocation6 + $0x58] sm:$0xff] }
 0x153   :  { %v957_v30 = vadd.f32 %v956_v26, %v564_v21  ;;  %v1263_v21 = vld [vmem:[#allocation6 + $0x558] sm:$0xff]  ;;  %v777_v26 = vadd.f32 %v2060_v63, %v757_v54  ;;  %v1076_v9 = vmin.f32 %v1064_v52, 6.0 }
 0x154   :  { %v1077_v42 = vmin.f32 %v1065_v33, 6.0  ;;  %v897_v5 = vadd.f32 %v2069_v13, %v877_v23  ;;  %v1251_v33 = vld [vmem:[#allocation6 + $0x4f8] sm:$0xff] }
 0x155   :  { %v976_v36 = vpop.f32.mrf.mxu3  ;;  %v1063_v63 = vmax.f32 %v777_v26, 0.0  ;;  %v1227_v54 = vld [vmem:[#allocation6 + $0x438] sm:$0xff] }
 0x156   :  { %v977_v34 = vadd.f32 %v976_v36, %v957_v30  ;;  %v657_v30 = vadd.f32 %v2038_v11, %v637_v22  ;;  %v697_v11 = vadd.f32 %v2050_v37, %v677_v31  ;;  %v1066_v40 = vmax.f32 %v897_v5, 0.0  ;;  %v1222_v22 = vld [vmem:[#allocation6 + $0x410] sm:$0xff]  ;;  %v1143_v26 = vld [vmem:[#allocation6 + $0x198] sm:$0xff] }
 0x157   :  { %v1075_v44 = vmin.f32 %v1063_v63, 6.0  ;;  %v1131_v31 = vld [vmem:[#allocation6 + $0x138] sm:$0xff] }
 0x158   :  { %v1068_v43 = vmax.f32 %v977_v34, 0.0  ;;  %v1246_v34 = vld [vmem:[#allocation6 + $0x4d0] sm:$0xff]  ;;  %v1060_v39 = vmax.f32 %v657_v30, 0.0  ;;  %v1061_v37 = vmax.f32 %v697_v11, 0.0  ;;  %v1078_v58 = vmin.f32 %v1066_v40, 6.0  ;;  %v1211_v30 = vld [vmem:[#allocation6 + $0x3b8] sm:$0xff] }
 0x159   :  { %v1127_v5 = vld [vmem:[#allocation6 + $0x118] sm:$0xff] }
 0x15a   :  { %v1080_v46 = vmin.f32 %v1068_v43, 6.0  ;;  %v1243_v43 = vld [vmem:[#allocation6 + $0x4b8] sm:$0xff] }
 0x15b   :  { %v1119_v63 = vld [vmem:[#allocation6 + $0xd8] sm:$0xff] }
 0x15c   :  { %v1086_v51 = vmax.f32 %v1077_v42, %v1080_v46  ;;  %v1242_v42 = vld [vmem:[#allocation6 + $0x4b0] sm:$0xff]  ;;  %v1107_v11 = vld [vmem:[#allocation6 + $0x78] sm:$0xff] }
 0x15d   :  { %v1179_v40 = vld [vmem:[#allocation6 + $0x2b8] sm:$0xff] }
 0x15e   :  { %v2076_v53 = vmax.f32 %v1083_v50, %v1086_v51  ;;  %v1072_v50 = vmin.f32 %v1060_v39, 6.0  ;;  %v1187_v39 = vld [vmem:[#allocation6 + $0x2f8] sm:$0xff] }
 0x15f   :  { %v1557_v52 = vld [vmem:[#allocation9 + $0x50] sm:$0xff] }
 0x160   :  { %1310 = vmatmul.f32.vlgmr.msra.gmra.mxu0 %v2076_v53  ;;  %1370 = vmatmul.f32.vlgmr.msra.gmra.mxu3 %v2076_v53 }
 0x161   :  { %1454 = vmatpush.msra.mxu0 %v1282_v55  ;;  %1514 = vmatpush.msra.mxu3 %v1283_v56 }
 0x163   :  { %1455 = vmatpush.msra.mxu0 %v1278_v61  ;;  %1515 = vmatpush.msra.mxu3 %v1279_v0  ;;  %v1084_v0 = vmax.f32 %v1072_v50, %v1075_v44  ;;  %v1167_v44 = vld [vmem:[#allocation6 + $0x258] sm:$0xff]  ;;  %v1560_v50 = vld [vmem:[#allocation9 + $0x68] sm:$0xff] }
 0x165   :  { %1456 = vmatpush.msra.mxu0 %v1274_v2  ;;  %1516 = vmatpush.msra.mxu3 %v1275_v4 }
 0x166   :  { %v916_v14 = vpop.f32.mrf.mxu0 }
 0x167   :  { %1457 = vmatpush.msra.mxu0 %v1270_v7  ;;  %1517 = vmatpush.msra.mxu3 %v1271_v8  ;;  %v917_v20 = vadd.f32 %v916_v14, %v563_v57  ;;  %v1231_v7 = vld [vmem:[#allocation6 + $0x458] sm:$0xff]  ;;  %v1073_v8 = vmin.f32 %v1061_v37, 6.0  ;;  %v1559_v37 = vld [vmem:[#allocation9 + $0x60] sm:$0xff] }
 0x168   :  { %v936_v18 = vpop.f32.mrf.mxu1  ;;  %v1219_v57 = vld [vmem:[#allocation6 + $0x3f8] sm:$0xff] }
 0x169   :  { %1458 = vmatpush.msra.mxu0 %v1266_v16  ;;  %1518 = vmatpush.msra.mxu3 %v1267_v17  ;;  %v937_v45 = vadd.f32 %v936_v18, %v917_v20  ;;  %v1155_v16 = vld [vmem:[#allocation6 + $0x1f8] sm:$0xff]  ;;  %v1226_v17 = vld [vmem:[#allocation6 + $0x430] sm:$0xff]  ;;  %v1085_v59 = vmax.f32 %v1073_v8, %v1076_v9 }
 0x16a   :  { %v1195_v20 = vld [vmem:[#allocation6 + $0x338] sm:$0xff] }
 0x16b   :  { %1459 = vmatpush.msra.mxu0 %v1262_v19  ;;  %1519 = vmatpush.msra.mxu3 %v1263_v21  ;;  %v1067_v1 = vmax.f32 %v937_v45, 0.0  ;;  %v1151_v21 = vld [vmem:[#allocation6 + $0x1d8] sm:$0xff] }
 0x16c   :  { %v1163_v45 = vld [vmem:[#allocation6 + $0x238] sm:$0xff] }
 0x16d   :  { %1460 = vmatpush.msra.mxu0 %v1258_v24  ;;  %1520 = vmatpush.msra.mxu3 %v1259_v25  ;;  %v1079_v18 = vmin.f32 %v1067_v1, 6.0  ;;  %v1147_v24 = vld [vmem:[#allocation6 + $0x1b8] sm:$0xff] }
 0x16e   :  { %v1550_v1 = vld [vmem:[#allocation9 + $0x18] sm:$0xff] }
 0x16f   :  { %v996_v35 = vpop.f32.mrf.mxu0  ;;  %1461 = vmatpush.msra.mxu0 %v1254_v28  ;;  %1521 = vmatpush.msra.mxu3 %v1255_v3  ;;  %v1215_v28 = vld [vmem:[#allocation6 + $0x3d8] sm:$0xff] }
 0x170   :  { %v997_v36 = vadd.f32 %v996_v35, %v565_v27  ;;  %v1139_v27 = vld [vmem:[#allocation6 + $0x178] sm:$0xff] }
 0x171   :  { %v1016_v29 = vpop.f32.mrf.mxu1  ;;  %1462 = vmatpush.msra.mxu0 %v1250_v32  ;;  %1522 = vmatpush.msra.mxu3 %v1251_v33  ;;  %v1135_v3 = vld [vmem:[#allocation6 + $0x158] sm:$0xff] }
 0x172   :  { %v1017_v13 = vadd.f32 %v1016_v29, %v997_v36  ;;  %v1203_v32 = vld [vmem:[#allocation6 + $0x378] sm:$0xff] }
 0x173   :  { %1463 = vmatpush.msra.mxu0 %v1246_v34  ;;  %1523 = vmatpush.msra.mxu3 %v1247_v38  ;;  %v1123_v33 = vld [vmem:[#allocation6 + $0xf8] sm:$0xff] }
 0x174   :  { %v1069_v46 = vmax.f32 %v1017_v13, 0.0  ;;  %v1199_v35 = vld [vmem:[#allocation6 + $0x358] sm:$0xff] }
 0x175   :  { %v1036_v51 = vpop.f32.mrf.mxu2  ;;  %1464 = vmatpush.msra.mxu0 %v1242_v42  ;;  %1524 = vmatpush.msra.mxu3 %v1243_v43  ;;  %v1115_v36 = vld [vmem:[#allocation6 + $0xb8] sm:$0xff] }
 0x176   :  { %v1081_v55 = vmin.f32 %v1069_v46, 6.0  ;;  %v1037_v56 = vadd.f32 %v1036_v51, %v566_v41  ;;  %v1191_v34 = vld [vmem:[#allocation6 + $0x318] sm:$0xff] }
 0x177   :  { %v1056_v61 = vpop.f32.mrf.mxu3  ;;  %1465 = vmatpush.msra.mxu0 %v1238_v47  ;;  %1525 = vmatpush.msra.mxu3 %v1239_v48  ;;  %v1111_v38 = vld [vmem:[#allocation6 + $0x98] sm:$0xff] }
 0x178   :  { %v1087_v2 = vmax.f32 %v1078_v58, %v1081_v55  ;;  %v1057_v4 = vadd.f32 %v1056_v61, %v1037_v56  ;;  %v1183_v29 = vld [vmem:[#allocation6 + $0x2d8] sm:$0xff]  ;;  %v1556_v58 = vld [vmem:[#allocation9 + $0x48] sm:$0xff] }
 0x179   :  { %1466 = vmatpush.msra.mxu0 %v1234_v60  ;;  %1526 = vmatpush.msra.mxu3 %v1235_v15  ;;  %v1099_v13 = vld [vmem:[#allocation6 + $0x38] sm:$0xff]  ;;  %v1552_v60 = vld [vmem:[#allocation9 + $0x28] sm:$0xff]  ;;  %v1551_v15 = vld [vmem:[#allocation9 + $0x20] sm:$0xff] }
 0x17a   :  { %v2098_v10 = vmax.f32 %v1084_v0, %v1087_v2  ;;  %v1070_v14 = vmax.f32 %v1057_v4, 0.0  ;;  %v1175_v41 = vld [vmem:[#allocation6 + $0x298] sm:$0xff] }
 0x17b   :  { %1467 = vmatpush.msra.mxu0 %v1230_v6  ;;  %1527 = vmatpush.msra.mxu3 %v1231_v7  ;;  %v1095_v42 = vld [vmem:[#allocation6 + $0x18] sm:$0xff]  ;;  %v1548_v6 = vld [vmem:[#allocation9 + $0x8] sm:$0xff]  ;;  %v1547_v7 = vld [vmem:[#allocation9] sm:$0xff] }
 0x17c   :  { %v1082_v19 = vmin.f32 %v1070_v14, 6.0  ;;  %1330 = vmatmul.f32.vlgmr.msra.gmra.mxu1 %v2098_v10  ;;  %1390 = vmatmul.f32.vlgmr.msrb.gmra.mxu0 %v2098_v10  ;;  %v1171_v43 = vld [vmem:[#allocation6 + $0x278] sm:$0xff]  ;;  %v1284_v14 = vld [vmem:[#allocation7] sm:$0xf] }
 0x17d   :  { %1450 = vmatmul.f32.vlgmr.msrb.gmra.mxu3 %v2098_v10  ;;  %1474 = vmatpush.msra.mxu1 %v1155_v16  ;;  %v1159_v46 = vld [vmem:[#allocation6 + $0x218] sm:$0xff] }
 0x17e   :  { %v1088_v23 = vmax.f32 %v1079_v18, %v1082_v19  ;;  %1468 = vmatpush.msra.mxu0 %v1226_v17  ;;  %1528 = vmatpush.msra.mxu3 %v1227_v54  ;;  %v1562_v47 = vld [vmem:[#allocation9 + $0x78] sm:$0xff]  ;;  %v1561_v48 = vld [vmem:[#allocation9 + $0x70] sm:$0xff]  ;;  %v1288_v17 = vperm.slane %v1284_v14, 2 }
 0x17f   :  { %1475 = vmatpush.msra.mxu1 %v1151_v21  ;;  %v1558_v51 = vld [vmem:[#allocation9 + $0x58] sm:$0xff]  ;;  %v1553_v56 = vld [vmem:[#allocation9 + $0x30] sm:$0xff]  ;;  %v1286_v21 = vperm.slane %v1284_v14, 0 }
 0x180   :  { %v1091_v25 = vmax.f32 %v1085_v59, %v1088_v23  ;;  %1469 = vmatpush.msra.mxu0 %v1222_v22  ;;  %1529 = vmatpush.msra.mxu3 %v1223_v12  ;;  %v1554_v55 = vld [vmem:[#allocation9 + $0x38] sm:$0xff]  ;;  %v1549_v4 = vld [vmem:[#allocation9 + $0x10] sm:$0xff]  ;;  %v1601_v22 = vld [vmem:[#allocation12 + $0x60] sm:$0xff]  ;;  %v1287_v12 = vperm.slane %v1284_v14, 1 }
 0x181   :  { %1476 = vmatpush.msra.mxu1 %v1147_v24  ;;  %v1604_v9 = vld [vmem:[#allocation12 + $0x78] sm:$0xff]  ;;  %v1602_v54 = vld [vmem:[#allocation12 + $0x68] sm:$0xff] }
 0x182   :  { %1350 = vmatmul.f32.vlgmr.msra.gmra.mxu2 %v1091_v25  ;;  %1567 = vmatpush.msrb.mxu0 %v1562_v47  ;;  %v1600_v23 = vld [vmem:[#allocation12 + $0x58] sm:$0xff] }
 0x183   :  { %1477 = vmatpush.msra.mxu1 %v1143_v26  ;;  %1494 = vmatpush.msra.mxu2 %v1219_v57  ;;  %v1599_v26 = vld [vmem:[#allocation12 + $0x50] sm:$0xff] }
 0x184   :  { %1410 = vmatmul.f32.vlgmr.msrb.gmra.mxu1 %v1091_v25  ;;  %1470 = vmatmul.f32.vlgmr.msra.gmra.mxu0 %v1091_v25 }
 0x185   :  { %1478 = vmatpush.msra.mxu1 %v1139_v27  ;;  %1495 = vmatpush.msra.mxu2 %v1215_v28 }
 0x186   :  { %1530 = vmatmul.f32.vlgmr.msra.gmra.mxu3 %v1091_v25  ;;  %1568 = vmatpush.msrb.mxu0 %v1561_v48 }
 0x187   :  { %1479 = vmatpush.msra.mxu1 %v1135_v3  ;;  %1496 = vmatpush.msra.mxu2 %v1211_v30  ;;  %v1289_v3 = vperm.slane %v1284_v14, 3  ;;  %v1598_v30 = vld [vmem:[#allocation12 + $0x48] sm:$0xff] }
 0x188   :  { %1569 = vmatpush.msrb.mxu0 %v1560_v50 }
 0x189   :  { %1480 = vmatpush.msra.mxu1 %v1131_v31  ;;  %1497 = vmatpush.msra.mxu2 %v1207_v62 }
 0x18a   :  { %1430 = vmatmul.f32.vlgmr.msrb.gmra.mxu2 %v2076_v53  ;;  %1570 = vmatpush.msrb.mxu0 %v1559_v37 }
 0x18b   :  { %1481 = vmatpush.msra.mxu1 %v1127_v5  ;;  %1498 = vmatpush.msra.mxu2 %v1203_v32  ;;  %v1597_v32 = vld [vmem:[#allocation12 + $0x40] sm:$0xff] }
 0x18c   :  { %1571 = vmatpush.msrb.mxu0 %v1558_v51 }
 0x18d   :  { %1482 = vmatpush.msra.mxu1 %v1123_v33  ;;  %1499 = vmatpush.msra.mxu2 %v1199_v35 }
 0x18e   :  { %1572 = vmatpush.msrb.mxu0 %v1557_v52 }
 0x18f   :  { %1483 = vmatpush.msra.mxu1 %v1119_v63  ;;  %1500 = vmatpush.msra.mxu2 %v1195_v20 }
 0x190   :  { %1573 = vmatpush.msrb.mxu0 %v1556_v58  ;;  %v1592_v58 = vld [vmem:[#allocation12 + $0x18] sm:$0xff] }
 0x191   :  { %1484 = vmatpush.msra.mxu1 %v1115_v36  ;;  %1501 = vmatpush.msra.mxu2 %v1191_v34  ;;  %v1596_v36 = vld [vmem:[#allocation12 + $0x38] sm:$0xff] }
 0x193   :  { %1485 = vmatpush.msra.mxu1 %v1111_v38  ;;  %1502 = vmatpush.msra.mxu2 %v1187_v39 }
 0x195   :  { %1486 = vmatpush.msra.mxu1 %v1107_v11  ;;  %1503 = vmatpush.msra.mxu2 %v1183_v29  ;;  %v1595_v11 = vld [vmem:[#allocation12 + $0x30] sm:$0xff] }
 0x197   :  { %1487 = vmatpush.msra.mxu1 %v1103_v49  ;;  %1504 = vmatpush.msra.mxu2 %v1179_v40 }
 0x199   :  { %1488 = vmatpush.msra.mxu1 %v1099_v13  ;;  %1505 = vmatpush.msra.mxu2 %v1175_v41  ;;  %v1594_v41 = vld [vmem:[#allocation12 + $0x28] sm:$0xff] }
 0x19b   :  { %1489 = vmatpush.msra.mxu1 %v1095_v42  ;;  %1506 = vmatpush.msra.mxu2 %v1171_v43 }
 0x19c   :  { %1490 = vmatmul.f32.vlgmr.msra.gmra.mxu1 %v2076_v53  ;;  %v1555_v53 = vld [vmem:[#allocation9 + $0x40] sm:$0xff] }
 0x19d   :  { %1507 = vmatpush.msra.mxu2 %v1167_v44  ;;  %1574 = vmatpush.msrb.mxu0 %v1555_v53  ;;  %v1593_v44 = vld [vmem:[#allocation12 + $0x20] sm:$0xff]  ;;  %v1591_v53 = vld [vmem:[#allocation12 + $0x10] sm:$0xff] }
 0x19e   :  { %1609 = vmatpush.msrb.mxu1 %v1604_v9 }
 0x19f   :  { %1508 = vmatpush.msra.mxu2 %v1163_v45  ;;  %1575 = vmatpush.msrb.mxu0 %v1554_v55  ;;  %v1590_v55 = vld [vmem:[#allocation12 + $0x8] sm:$0xff] }
 0x1a1   :  { %1509 = vmatpush.msra.mxu2 %v1159_v46  ;;  %1576 = vmatpush.msrb.mxu0 %v1553_v56  ;;  %v1589_v56 = vld [vmem:[#allocation12] sm:$0xff] }
 0x1a2   :  { %1510 = vmatmul.f32.vlgmr.msra.gmra.mxu2 %v2098_v10  ;;  %v1603_v10 = vld [vmem:[#allocation12 + $0x70] sm:$0xff] }
 0x1a3   :  { %1577 = vmatpush.msrb.mxu0 %v1552_v60  ;;  %1610 = vmatpush.msrb.mxu1 %v1603_v10  ;;  %v1672_v60 = vld [vmem:[#allocation10] ss:$0 sm:$0xff] }
 0x1a5   :  { %1578 = vmatpush.msrb.mxu0 %v1551_v15  ;;  %1611 = vmatpush.msrb.mxu1 %v1602_v54 }
 0x1a7   :  { %1579 = vmatpush.msrb.mxu0 %v1550_v1  ;;  %1612 = vmatpush.msrb.mxu1 %v1601_v22 }
 0x1a9   :  { %1580 = vmatpush.msrb.mxu0 %v1549_v4  ;;  %1613 = vmatpush.msrb.mxu1 %v1600_v23 }
 0x1ab   :  { %1581 = vmatpush.msrb.mxu0 %v1548_v6  ;;  %1614 = vmatpush.msrb.mxu1 %v1599_v26 }
 0x1ad   :  { %1582 = vmatpush.msrb.mxu0 %v1547_v7  ;;  %1615 = vmatpush.msrb.mxu1 %v1598_v30 }
 0x1af   :  { %1616 = vmatpush.msrb.mxu1 %v1597_v32 }
 0x1b1   :  { %1617 = vmatpush.msrb.mxu1 %v1596_v36 }
 0x1b3   :  { %1618 = vmatpush.msrb.mxu1 %v1595_v11 }
 0x1b5   :  { %1619 = vmatpush.msrb.mxu1 %v1594_v41 }
 0x1b7   :  { %1620 = vmatpush.msrb.mxu1 %v1593_v44 }
 0x1b9   :  { %1621 = vmatpush.msrb.mxu1 %v1592_v58 }
 0x1bb   :  { %1622 = vmatpush.msrb.mxu1 %v1591_v53 }
 0x1bd   :  { %1623 = vmatpush.msrb.mxu1 %v1590_v55 }
 0x1bf   :  { %1624 = vmatpush.msrb.mxu1 %v1589_v56 }
 0x1dd   :  { %v1311_v2 = vpop.f32.mrf.mxu0 }
 0x1de   :  { %v1312_v25 = vadd.f32 %v1311_v2, %v1286_v21  ;;  %v1673_v2 = vld [vmem:[#allocation13] ss:$0 sm:$0xff] }
 0x1e3   :  { %v1371_v8 = vpop.f32.mrf.mxu3 }
 0x1e4   :  { %v1372_v57 = vadd.f32 %v1371_v8, %v1287_v12  ;;  %v1629_v8 = vlaneseq }
 0x1e6   :  { %v1630_v14 = vand.u32 127, %v1629_v8 }
 0x1e8   :  { %vm1631_vm1 = vcmp.lt.s32.totalorder %v1630_v14, 8 }
 0x1f9   :  { %v1331_v61 = vpop.f32.mrf.mxu1  ;;  %v1391_v16 = vpop.f32.mrf.mxu0 }
 0x1fa   :  { %v1332_v27 = vadd.f32 %v1331_v61, %v1312_v25  ;;  %v1392_v62 = vadd.f32 %v1391_v16, %v1372_v57 }
 0x200   :  { %v1451_v24 = vpop.f32.mrf.mxu3 }
 0x201   :  { %v1411_v18 = vpop.f32.mrf.mxu1  ;;  %v1471_v33 = vpop.f32.mrf.mxu0 }
 0x202   :  { %v1412_v35 = vadd.f32 %v1411_v18, %v1392_v62 }
 0x204   :  { %v1535_v49 = vmax.f32 %v1412_v35, 0.0 }
 0x205   :  { %v1351_v0 = vpop.f32.mrf.mxu2 }
 0x206   :  { %v1352_v5 = vadd.f32 %v1351_v0, %v1332_v27  ;;  %v1539_v45 = vmin.f32 %v1535_v49, 6.0 }
 0x208   :  { %v1534_v38 = vmax.f32 %v1352_v5, 0.0 }
 0x209   :  { %v1531_v29 = vpop.f32.mrf.mxu3 }
 0x20a   :  { %v1538_v42 = vmin.f32 %v1534_v38, 6.0 }
 0x20c   :  { %v1542_v48 = vmax.f32 %v1538_v42, %v1539_v45 }
 0x20d   :  { %v1431_v19 = vpop.f32.mrf.mxu2 }
 0x20e   :  { %v1432_v59 = vadd.f32 %v1431_v19, %v1288_v17  ;;  %v1674_v17 = vld [vmem:[#allocation15] ss:$0 sm:$0xff] }
 0x210   :  { %v1452_v28 = vadd.f32 %v1451_v24, %v1432_v59 }
 0x212   :  { %v1472_v63 = vadd.f32 %v1471_v33, %v1452_v28 }
 0x214   :  { %v1536_v40 = vmax.f32 %v1472_v63, 0.0 }
 0x216   :  { %v1540_v46 = vmin.f32 %v1536_v40, 6.0 }
 0x219   :  { %v1491_v31 = vpop.f32.mrf.mxu1 }
 0x21a   :  { %v1492_v20 = vadd.f32 %v1491_v31, %v1289_v3 }
 0x225   :  { %v1511_v34 = vpop.f32.mrf.mxu2 }
 0x226   :  { %v1512_v39 = vadd.f32 %v1511_v34, %v1492_v20 }
 0x228   :  { %v1532_v13 = vadd.f32 %v1531_v29, %v1512_v39 }
 0x22a   :  { %v1537_v43 = vmax.f32 %v1532_v13, 0.0 }
 0x22c   :  { %v1541_v47 = vmin.f32 %v1537_v43, 6.0 }
 0x22e   :  { %v1543_v50 = vmax.f32 %v1540_v46, %v1541_v47 }
 0x230   :  { %v1544_v37 = vmax.f32 %v1542_v48, %v1543_v50 }
 0x232   :  { %v1545_v51 = vmax.f32 %v1544_v37, 0.0 }
 0x234   :  { %v1546_v52 = vmin.f32 %v1545_v51, 6.0 }
 0x236   :  { %1583 = vmatmul.f32.vlgmr.msrb.gmra.mxu0 %v1546_v52 }
 0x2b3   :  { %v1584_v15 = vpop.f32.mrf.mxu0 }
 0x2b4   :  { %v1585_v61 = vadd.f32 %v1672_v60, %v1584_v15 }
 0x2b6   :  { %v1587_v0 = vmax.f32 %v1585_v61, 0.0 }
 0x2b8   :  { %v1588_v1 = vmin.f32 %v1587_v0, 6.0 }
 0x2ba   :  { %1625 = vmatmul.f32.vlgmr.msrb.gmra.mxu1 %v1588_v1 }
 0x337   :  { %v1626_v4 = vpop.f32.mrf.mxu1 }
 0x338   :  { %v1627_v6 = vadd.f32 %v1673_v2, %v1626_v4 }
 0x33a   :  { %v1633_v7 = vmul.f32 1.442695, %v1627_v6  ;;  %vm1632_vm0 = vcmp.gt.f32.partialorder %v1627_v6, 0.0  ;;  %v1644_v21 = vmul.f32 0.001, %v1627_v6 }
 0x33c   :  { %1675 = vpow2.f32 %v1633_v7 }
 0x342   :  { %v1676_v9 = vpop.eup %1675 }
 0x343   :  { %v1656_v10 = vadd.f32 -1.0, %v1676_v9 }
 0x345   :  { %v1636_v16 = vmul.f32 1.6732632, %v1656_v10 }
 0x347   :  { %v1637_v54 = vsel %vm1632_vm0, %v1627_v6, %v1636_v16 }
 0x348   :  { %v1638_v18 = vmul.f32 1.050701, %v1637_v54 }
 0x34a   :  { %v1643_v19 = vadd.f32 %v1674_v17, %v1638_v18 }
 0x34c   :  { %v1645_v22 = vsel %vm1631_vm1, %v1643_v19, %v1644_v21 }
 0x34d   :  { %1646 = vst [vmem:[%s2119_s10] sm:$0xff] %v1645_v22 }
 0x34e   :  { %1651 = vsyncpa [#allocation3], 1 }
 0x34f   :  { %1652 = vsyncpa [#allocation5], 1 }
 0x350   :  { %1653 = vsyncpa [#allocation8], 1 }
 0x351   :  { %1654 = vsyncpa [#allocation11], 1 }
 0x352   :  { %1655 = vsyncpa [#allocation14], 1 }

</bundles_post_ra>
